<compile_context>
chip_gen: v7x
topology: tpu7x:2x2x1
jax: 0.10.0
libtpu: 0.0.40
codegen_flags: <defaults>
</compile_context>

<pallas_src>
import math

import jax
import jax.numpy as jnp
import numpy as np
from jax.experimental import pallas as pl
from jax.experimental.pallas import tpu as pltpu

# ---------------- model hyper-params (module defaults) ----------------
D_IN = 16
D_HIDDEN = 128
D_OUT = 4
D_OUT_PAD = 128          # lane-dense matmul width for lin_out (only D_OUT lanes stored)
N_BLOCKS = 5
TM_MAX = 8192            # max rows per grid step (amortizes ~0.35us/step overhead)


def _round_up(x, m):
    return (x + m - 1) // m * m


def _cdiv(a, b):
    return -(-a // b)


# ---------------- Pallas kernel ----------------
def resnetfc_kernel(x_ref, win_ref, bin_ref, w0_ref, b0_ref, w1_ref, b1_ref,
                    wout_ref, bout_ref, out_ref):
    # lin_in: bf16 MXU inputs, f32 accumulation; residual stream h kept in f32.
    x = x_ref[...]                                                     # (tm, D_IN) bf16
    h = jnp.dot(x, win_ref[...], preferred_element_type=jnp.float32) + bin_ref[...]

    # ResnetBlockFC x N_BLOCKS (size_in == size_out -> identity shortcut).
    for blk in range(N_BLOCKS):
        a0 = jnp.maximum(h, 0.0).astype(jnp.bfloat16)                  # ReLU (beta=0)
        net = jnp.dot(a0, w0_ref[blk],
                      preferred_element_type=jnp.float32) + b0_ref[blk]
        a1 = jnp.maximum(net, 0.0).astype(jnp.bfloat16)
        dx = jnp.dot(a1, w1_ref[blk],
                     preferred_element_type=jnp.float32) + b1_ref[blk]
        h = h + dx

    # lin_out(activation(x)); lane-dense (tm, 128) matmul, store only cols < D_OUT.
    a = jnp.maximum(h, 0.0).astype(jnp.bfloat16)
    out = jnp.dot(a, wout_ref[...], preferred_element_type=jnp.float32) + bout_ref[...]
    out_ref[...] = out[:, :D_OUT].astype(out_ref.dtype)


def resnetfc_forward(x_flat, params, tm_max=TM_MAX):
    """x_flat: (N, D_IN) float32. Returns (N, D_OUT) float32."""
    N = x_flat.shape[0]
    win_t, bin_, w0_t, b0_, w1_t, b1_, wout_t, bout_ = params

    # Row tile: as large as possible, but keep >= 2 grid steps when N allows it
    # (v7x shards the "parallel" axis across its 2 TensorCores).
    tm = min(tm_max, _round_up(max(_cdiv(N, 2), 1), 128))
    n_pad = _round_up(N, tm)

    x_bf = x_flat.astype(jnp.bfloat16)
    if n_pad != N:
        x_bf = jnp.pad(x_bf, ((0, n_pad - N), (0, 0)))

    out = pl.pallas_call(
        resnetfc_kernel,
        out_shape=jax.ShapeDtypeStruct((n_pad, D_OUT), jnp.float32),
        grid_spec=pltpu.PrefetchScalarGridSpec(
            num_scalar_prefetch=0,
            grid=(n_pad // tm,),
            in_specs=[
                pl.BlockSpec((tm, D_IN), lambda i: (i, 0)),                         # x tile (bf16)
                pl.BlockSpec((D_IN, D_HIDDEN), lambda i: (0, 0)),                   # lin_in W^T (bf16)
                pl.BlockSpec((1, D_HIDDEN), lambda i: (0, 0)),                      # lin_in b
                pl.BlockSpec((N_BLOCKS, D_HIDDEN, D_HIDDEN), lambda i: (0, 0, 0)),  # fc_0 W^T (bf16)
                pl.BlockSpec((N_BLOCKS, 1, D_HIDDEN), lambda i: (0, 0, 0)),         # fc_0 b
                pl.BlockSpec((N_BLOCKS, D_HIDDEN, D_HIDDEN), lambda i: (0, 0, 0)),  # fc_1 W^T (bf16)
                pl.BlockSpec((N_BLOCKS, 1, D_HIDDEN), lambda i: (0, 0, 0)),         # fc_1 b
                pl.BlockSpec((D_HIDDEN, D_OUT_PAD), lambda i: (0, 0)),              # lin_out W^T (padded, bf16)
                pl.BlockSpec((1, D_OUT_PAD), lambda i: (0, 0)),                     # lin_out b (padded)
            ],
            out_specs=pl.BlockSpec((tm, D_OUT), lambda i: (i, 0)),                  # only 4 real lanes
        ),
        compiler_params=pltpu.CompilerParams(
            dimension_semantics=("parallel",),
            vmem_limit_bytes=48 * 1024 * 1024,    # ~20 MiB needed at tm=8192; < v7x's 64 MiB
        ),
    )(x_bf, win_t, bin_, w0_t, b0_, w1_t, b1_, wout_t, bout_)
    return out[:N, :]


# ---------------- parameter init (matches nn.init in __init__) ----------------
def kaiming_normal_fan_in(key, out_features, in_features):
    # nn.init.kaiming_normal_(w, a=0, mode='fan_in') : std = sqrt(2 / fan_in)
    std = math.sqrt(2.0 / in_features)
    return std * jax.random.normal(key, (out_features, in_features), jnp.float32)


def init_raw_params(key):
    keys = jax.random.split(key, 2 + N_BLOCKS)
    # lin_in
    w_in = kaiming_normal_fan_in(keys[0], D_HIDDEN, D_IN)
    b_in = jnp.zeros((D_HIDDEN,), jnp.float32)
    # lin_out
    w_out = kaiming_normal_fan_in(keys[1], D_OUT, D_HIDDEN)
    b_out = jnp.zeros((D_OUT,), jnp.float32)
    # blocks: fc_0 kaiming / zero bias, fc_1 zero weight / zero bias
    w0 = jnp.stack([kaiming_normal_fan_in(keys[2 + i], D_HIDDEN, D_HIDDEN)
                    for i in range(N_BLOCKS)], axis=0)            # (B, H, H) (out, in)
    b0 = jnp.zeros((N_BLOCKS, D_HIDDEN), jnp.float32)
    w1 = jnp.zeros((N_BLOCKS, D_HIDDEN, D_HIDDEN), jnp.float32)
    b1 = jnp.zeros((N_BLOCKS, D_HIDDEN), jnp.float32)
    return (w_in, b_in, w0, b0, w1, b1, w_out, b_out)


def pack_params_for_kernel(raw):
    """Pre-transpose (y = x @ W^T + b), cast weights to bf16, pad lin_out to 128 lanes."""
    w_in, b_in, w0, b0, w1, b1, w_out, b_out = raw
    wout_pad = jnp.zeros((D_OUT_PAD, D_HIDDEN), jnp.float32).at[:D_OUT].set(w_out)
    bout_pad = jnp.zeros((D_OUT_PAD,), jnp.float32).at[:D_OUT].set(b_out)
    return (
        jnp.transpose(w_in).astype(jnp.bfloat16),             # (D_IN, D_HIDDEN)
        b_in.reshape(1, D_HIDDEN),
        jnp.transpose(w0, (0, 2, 1)).astype(jnp.bfloat16),    # (B, H, H) as (in, out)
        b0.reshape(N_BLOCKS, 1, D_HIDDEN),
        jnp.transpose(w1, (0, 2, 1)).astype(jnp.bfloat16),
        b1.reshape(N_BLOCKS, 1, D_HIDDEN),
        jnp.transpose(wout_pad).astype(jnp.bfloat16),         # (D_HIDDEN, 128)
        bout_pad.reshape(1, D_OUT_PAD),
    )


# ---------------- pure-JAX reference (PyTorch semantics, f32) ----------------
def reference_forward(x, raw):
    w_in, b_in, w0, b0, w1, b1, w_out, b_out = raw
    relu = lambda v: jnp.maximum(v, 0.0)
    h = x @ w_in.T + b_in                       # lin_in
    for blk in range(N_BLOCKS):
        net = relu(h) @ w0[blk].T + b0[blk]     # fc_0(activation(x))
        dx = relu(net) @ w1[blk].T + b1[blk]    # fc_1(activation(net))
        h = h + dx                              # identity shortcut
    return relu(h) @ w_out.T + b_out            # lin_out(activation(x))


if __name__ == "__main__":
    key = jax.random.PRNGKey(0)
    pkey, xkey, wkey, bkey = jax.random.split(key, 4)
    raw = init_raw_params(pkey)

    # PyTorch init zeroes fc_1 weights/biases (dx == 0), which would leave the resnet
    # blocks numerically untested; perturb them (test-only) so every matmul is exercised.
    w_in, b_in, w0, b0, w1, b1, w_out, b_out = raw
    w1 = 0.05 * jax.random.normal(wkey, w1.shape, jnp.float32)
    b1 = 0.01 * jax.random.normal(bkey, b1.shape, jnp.float32)
    raw = (w_in, b_in, w0, b0, w1, b1, w_out, b_out)

    params_k = pack_params_for_kernel(raw)

    # sampled_features: (batch, n_points, d_in)  (d_latent = 0, view_number = None)
    B, P = 2, 128
    sampled_features = jax.random.normal(xkey, (B, P, D_IN), jnp.float32)

    x_flat = sampled_features.reshape(-1, D_IN)          # (N, D_IN), N = 256
    out_flat = resnetfc_forward(x_flat, params_k)
    out = out_flat.reshape(B, P, D_OUT)
    jax.block_until_ready(out)

    ref = reference_forward(x_flat, raw).reshape(B, P, D_OUT)
    # bf16 matmul inputs (f32 accumulation) -> loose tolerance vs. the f32 reference.
    np.testing.assert_allclose(np.asarray(out), np.asarray(ref), rtol=2e-2, atol=2e-2)

    # TODO(synk): d_latent > 0 (lin_z / SPADE) and combine_interleaved branches are not
    # exercised by the default config and are not implemented in the kernel.
    print("KERNEL_OK")
</pallas_src>

<mosaic_0001>
module attributes {stable_mosaic.version = 11 : i64} {
  func.func @resnetfc_kernel(%arg0: i32, %arg1: memref<128x16xbf16, #tpu.memory_space<vmem>>, %arg2: memref<16x128xbf16, #tpu.memory_space<vmem>>, %arg3: memref<1x128xf32, #tpu.memory_space<vmem>>, %arg4: memref<5x128x128xbf16, #tpu.memory_space<vmem>>, %arg5: memref<5x1x128xf32, #tpu.memory_space<vmem>>, %arg6: memref<5x128x128xbf16, #tpu.memory_space<vmem>>, %arg7: memref<5x1x128xf32, #tpu.memory_space<vmem>>, %arg8: memref<128x128xbf16, #tpu.memory_space<vmem>>, %arg9: memref<1x128xf32, #tpu.memory_space<vmem>>, %arg10: memref<128x4xf32, #tpu.memory_space<vmem>>) attributes {dimension_semantics = [#tpu.dimension_semantics<parallel>], iteration_bounds = array<i64: 2>, scalar_prefetch = 0 : i64, scratch_operands = 0 : i64, tpu.core_type = #tpu.core_type<tc>, window_params = [{transform_indices = @transform_0, window_bounds = array<i64: 128, 16>}, {pipeline_mode = #tpu.pipeline_mode<synchronous>, transform_indices = @transform_1, window_bounds = array<i64: 16, 128>}, {pipeline_mode = #tpu.pipeline_mode<synchronous>, transform_indices = @transform_2, window_bounds = array<i64: 1, 128>}, {pipeline_mode = #tpu.pipeline_mode<synchronous>, transform_indices = @transform_3, window_bounds = array<i64: 5, 128, 128>}, {pipeline_mode = #tpu.pipeline_mode<synchronous>, transform_indices = @transform_4, window_bounds = array<i64: 5, 1, 128>}, {pipeline_mode = #tpu.pipeline_mode<synchronous>, transform_indices = @transform_5, window_bounds = array<i64: 5, 128, 128>}, {pipeline_mode = #tpu.pipeline_mode<synchronous>, transform_indices = @transform_6, window_bounds = array<i64: 5, 1, 128>}, {pipeline_mode = #tpu.pipeline_mode<synchronous>, transform_indices = @transform_7, window_bounds = array<i64: 128, 128>}, {pipeline_mode = #tpu.pipeline_mode<synchronous>, transform_indices = @transform_8, window_bounds = array<i64: 1, 128>}, {transform_indices = @transform_9, window_bounds = array<i64: 128, 4>}]} {
    %c0 = arith.constant 0 : index
    %c0_0 = arith.constant 0 : index
    %0 = vector.load %arg1[%c0, %c0_0] : memref<128x16xbf16, #tpu.memory_space<vmem>>, vector<128x16xbf16>
    %c0_1 = arith.constant 0 : index
    %c0_2 = arith.constant 0 : index
    %1 = vector.load %arg2[%c0_1, %c0_2] : memref<16x128xbf16, #tpu.memory_space<vmem>>, vector<16x128xbf16>
    %cst = arith.constant dense<0.000000e+00> : vector<128x128xf32>
    %2 = tpu.matmul %0, %1, %cst {dimension_numbers = #tpu.dot_dimension_numbers<[1], [0], [0], [1], [0, 0, 1, 1], [], []>} : vector<128x16xbf16>, vector<16x128xbf16>, vector<128x128xf32> -> vector<128x128xf32>
    %c0_3 = arith.constant 0 : index
    %c0_4 = arith.constant 0 : index
    %3 = vector.load %arg3[%c0_3, %c0_4] : memref<1x128xf32, #tpu.memory_space<vmem>>, vector<1x128xf32>
    %4 = vector.broadcast %3 : vector<1x128xf32> to vector<128x128xf32>
    %5 = arith.addf %2, %4 : vector<128x128xf32>
    %cst_5 = arith.constant 0.000000e+00 : f32
    %6 = vector.broadcast %cst_5 : f32 to vector<128x128xf32>
    %7 = arith.maximumf %5, %6 : vector<128x128xf32>
    %8 = arith.truncf %7 : vector<128x128xf32> to vector<128x128xbf16>
    %c0_6 = arith.constant 0 : index
    %c0_7 = arith.constant 0 : index
    %c0_8 = arith.constant 0 : index
    %9 = vector.load %arg4[%c0_6, %c0_7, %c0_8] : memref<5x128x128xbf16, #tpu.memory_space<vmem>>, vector<1x128x128xbf16>
    %10 = vector.shape_cast %9 : vector<1x128x128xbf16> to vector<128x128xbf16>
    %cst_9 = arith.constant dense<0.000000e+00> : vector<128x128xf32>
    %11 = tpu.matmul %8, %10, %cst_9 {dimension_numbers = #tpu.dot_dimension_numbers<[1], [0], [0], [1], [0, 0, 1, 1], [], []>} : vector<128x128xbf16>, vector<128x128xbf16>, vector<128x128xf32> -> vector<128x128xf32>
    %c0_10 = arith.constant 0 : index
    %c0_11 = arith.constant 0 : index
    %c0_12 = arith.constant 0 : index
    %12 = vector.load %arg5[%c0_10, %c0_11, %c0_12] : memref<5x1x128xf32, #tpu.memory_space<vmem>>, vector<1x1x128xf32>
    %13 = vector.shape_cast %12 : vector<1x1x128xf32> to vector<1x128xf32>
    %14 = vector.broadcast %13 : vector<1x128xf32> to vector<128x128xf32>
    %15 = arith.addf %11, %14 : vector<128x128xf32>
    %cst_13 = arith.constant 0.000000e+00 : f32
    %16 = vector.broadcast %cst_13 : f32 to vector<128x128xf32>
    %17 = arith.maximumf %15, %16 : vector<128x128xf32>
    %18 = arith.truncf %17 : vector<128x128xf32> to vector<128x128xbf16>
    %c0_14 = arith.constant 0 : index
    %c0_15 = arith.constant 0 : index
    %c0_16 = arith.constant 0 : index
    %19 = vector.load %arg6[%c0_14, %c0_15, %c0_16] : memref<5x128x128xbf16, #tpu.memory_space<vmem>>, vector<1x128x128xbf16>
    %20 = vector.shape_cast %19 : vector<1x128x128xbf16> to vector<128x128xbf16>
    %cst_17 = arith.constant dense<0.000000e+00> : vector<128x128xf32>
    %21 = tpu.matmul %18, %20, %cst_17 {dimension_numbers = #tpu.dot_dimension_numbers<[1], [0], [0], [1], [0, 0, 1, 1], [], []>} : vector<128x128xbf16>, vector<128x128xbf16>, vector<128x128xf32> -> vector<128x128xf32>
    %c0_18 = arith.constant 0 : index
    %c0_19 = arith.constant 0 : index
    %c0_20 = arith.constant 0 : index
    %22 = vector.load %arg7[%c0_18, %c0_19, %c0_20] : memref<5x1x128xf32, #tpu.memory_space<vmem>>, vector<1x1x128xf32>
    %23 = vector.shape_cast %22 : vector<1x1x128xf32> to vector<1x128xf32>
    %24 = vector.broadcast %23 : vector<1x128xf32> to vector<128x128xf32>
    %25 = arith.addf %21, %24 : vector<128x128xf32>
    %26 = arith.addf %5, %25 : vector<128x128xf32>
    %cst_21 = arith.constant 0.000000e+00 : f32
    %27 = vector.broadcast %cst_21 : f32 to vector<128x128xf32>
    %28 = arith.maximumf %26, %27 : vector<128x128xf32>
    %29 = arith.truncf %28 : vector<128x128xf32> to vector<128x128xbf16>
    %c1 = arith.constant 1 : index
    %c0_22 = arith.constant 0 : index
    %c0_23 = arith.constant 0 : index
    %30 = vector.load %arg4[%c1, %c0_22, %c0_23] : memref<5x128x128xbf16, #tpu.memory_space<vmem>>, vector<1x128x128xbf16>
    %31 = vector.shape_cast %30 : vector<1x128x128xbf16> to vector<128x128xbf16>
    %cst_24 = arith.constant dense<0.000000e+00> : vector<128x128xf32>
    %32 = tpu.matmul %29, %31, %cst_24 {dimension_numbers = #tpu.dot_dimension_numbers<[1], [0], [0], [1], [0, 0, 1, 1], [], []>} : vector<128x128xbf16>, vector<128x128xbf16>, vector<128x128xf32> -> vector<128x128xf32>
    %c1_25 = arith.constant 1 : index
    %c0_26 = arith.constant 0 : index
    %c0_27 = arith.constant 0 : index
    %33 = vector.load %arg5[%c1_25, %c0_26, %c0_27] : memref<5x1x128xf32, #tpu.memory_space<vmem>>, vector<1x1x128xf32>
    %34 = vector.shape_cast %33 : vector<1x1x128xf32> to vector<1x128xf32>
    %35 = vector.broadcast %34 : vector<1x128xf32> to vector<128x128xf32>
    %36 = arith.addf %32, %35 : vector<128x128xf32>
    %cst_28 = arith.constant 0.000000e+00 : f32
    %37 = vector.broadcast %cst_28 : f32 to vector<128x128xf32>
    %38 = arith.maximumf %36, %37 : vector<128x128xf32>
    %39 = arith.truncf %38 : vector<128x128xf32> to vector<128x128xbf16>
    %c1_29 = arith.constant 1 : index
    %c0_30 = arith.constant 0 : index
    %c0_31 = arith.constant 0 : index
    %40 = vector.load %arg6[%c1_29, %c0_30, %c0_31] : memref<5x128x128xbf16, #tpu.memory_space<vmem>>, vector<1x128x128xbf16>
    %41 = vector.shape_cast %40 : vector<1x128x128xbf16> to vector<128x128xbf16>
    %cst_32 = arith.constant dense<0.000000e+00> : vector<128x128xf32>
    %42 = tpu.matmul %39, %41, %cst_32 {dimension_numbers = #tpu.dot_dimension_numbers<[1], [0], [0], [1], [0, 0, 1, 1], [], []>} : vector<128x128xbf16>, vector<128x128xbf16>, vector<128x128xf32> -> vector<128x128xf32>
    %c1_33 = arith.constant 1 : index
    %c0_34 = arith.constant 0 : index
    %c0_35 = arith.constant 0 : index
    %43 = vector.load %arg7[%c1_33, %c0_34, %c0_35] : memref<5x1x128xf32, #tpu.memory_space<vmem>>, vector<1x1x128xf32>
    %44 = vector.shape_cast %43 : vector<1x1x128xf32> to vector<1x128xf32>
    %45 = vector.broadcast %44 : vector<1x128xf32> to vector<128x128xf32>
    %46 = arith.addf %42, %45 : vector<128x128xf32>
    %47 = arith.addf %26, %46 : vector<128x128xf32>
    %cst_36 = arith.constant 0.000000e+00 : f32
    %48 = vector.broadcast %cst_36 : f32 to vector<128x128xf32>
    %49 = arith.maximumf %47, %48 : vector<128x128xf32>
    %50 = arith.truncf %49 : vector<128x128xf32> to vector<128x128xbf16>
    %c2 = arith.constant 2 : index
    %c0_37 = arith.constant 0 : index
    %c0_38 = arith.constant 0 : index
    %51 = vector.load %arg4[%c2, %c0_37, %c0_38] : memref<5x128x128xbf16, #tpu.memory_space<vmem>>, vector<1x128x128xbf16>
    %52 = vector.shape_cast %51 : vector<1x128x128xbf16> to vector<128x128xbf16>
    %cst_39 = arith.constant dense<0.000000e+00> : vector<128x128xf32>
    %53 = tpu.matmul %50, %52, %cst_39 {dimension_numbers = #tpu.dot_dimension_numbers<[1], [0], [0], [1], [0, 0, 1, 1], [], []>} : vector<128x128xbf16>, vector<128x128xbf16>, vector<128x128xf32> -> vector<128x128xf32>
    %c2_40 = arith.constant 2 : index
    %c0_41 = arith.constant 0 : index
    %c0_42 = arith.constant 0 : index
    %54 = vector.load %arg5[%c2_40, %c0_41, %c0_42] : memref<5x1x128xf32, #tpu.memory_space<vmem>>, vector<1x1x128xf32>
    %55 = vector.shape_cast %54 : vector<1x1x128xf32> to vector<1x128xf32>
    %56 = vector.broadcast %55 : vector<1x128xf32> to vector<128x128xf32>
    %57 = arith.addf %53, %56 : vector<128x128xf32>
    %cst_43 = arith.constant 0.000000e+00 : f32
    %58 = vector.broadcast %cst_43 : f32 to vector<128x128xf32>
    %59 = arith.maximumf %57, %58 : vector<128x128xf32>
    %60 = arith.truncf %59 : vector<128x128xf32> to vector<128x128xbf16>
    %c2_44 = arith.constant 2 : index
    %c0_45 = arith.constant 0 : index
    %c0_46 = arith.constant 0 : index
    %61 = vector.load %arg6[%c2_44, %c0_45, %c0_46] : memref<5x128x128xbf16, #tpu.memory_space<vmem>>, vector<1x128x128xbf16>
    %62 = vector.shape_cast %61 : vector<1x128x128xbf16> to vector<128x128xbf16>
    %cst_47 = arith.constant dense<0.000000e+00> : vector<128x128xf32>
    %63 = tpu.matmul %60, %62, %cst_47 {dimension_numbers = #tpu.dot_dimension_numbers<[1], [0], [0], [1], [0, 0, 1, 1], [], []>} : vector<128x128xbf16>, vector<128x128xbf16>, vector<128x128xf32> -> vector<128x128xf32>
    %c2_48 = arith.constant 2 : index
    %c0_49 = arith.constant 0 : index
    %c0_50 = arith.constant 0 : index
    %64 = vector.load %arg7[%c2_48, %c0_49, %c0_50] : memref<5x1x128xf32, #tpu.memory_space<vmem>>, vector<1x1x128xf32>
    %65 = vector.shape_cast %64 : vector<1x1x128xf32> to vector<1x128xf32>
    %66 = vector.broadcast %65 : vector<1x128xf32> to vector<128x128xf32>
    %67 = arith.addf %63, %66 : vector<128x128xf32>
    %68 = arith.addf %47, %67 : vector<128x128xf32>
    %cst_51 = arith.constant 0.000000e+00 : f32
    %69 = vector.broadcast %cst_51 : f32 to vector<128x128xf32>
    %70 = arith.maximumf %68, %69 : vector<128x128xf32>
    %71 = arith.truncf %70 : vector<128x128xf32> to vector<128x128xbf16>
    %c3 = arith.constant 3 : index
    %c0_52 = arith.constant 0 : index
    %c0_53 = arith.constant 0 : index
    %72 = vector.load %arg4[%c3, %c0_52, %c0_53] : memref<5x128x128xbf16, #tpu.memory_space<vmem>>, vector<1x128x128xbf16>
    %73 = vector.shape_cast %72 : vector<1x128x128xbf16> to vector<128x128xbf16>
    %cst_54 = arith.constant dense<0.000000e+00> : vector<128x128xf32>
    %74 = tpu.matmul %71, %73, %cst_54 {dimension_numbers = #tpu.dot_dimension_numbers<[1], [0], [0], [1], [0, 0, 1, 1], [], []>} : vector<128x128xbf16>, vector<128x128xbf16>, vector<128x128xf32> -> vector<128x128xf32>
    %c3_55 = arith.constant 3 : index
    %c0_56 = arith.constant 0 : index
    %c0_57 = arith.constant 0 : index
    %75 = vector.load %arg5[%c3_55, %c0_56, %c0_57] : memref<5x1x128xf32, #tpu.memory_space<vmem>>, vector<1x1x128xf32>
    %76 = vector.shape_cast %75 : vector<1x1x128xf32> to vector<1x128xf32>
    %77 = vector.broadcast %76 : vector<1x128xf32> to vector<128x128xf32>
    %78 = arith.addf %74, %77 : vector<128x128xf32>
    %cst_58 = arith.constant 0.000000e+00 : f32
    %79 = vector.broadcast %cst_58 : f32 to vector<128x128xf32>
    %80 = arith.maximumf %78, %79 : vector<128x128xf32>
    %81 = arith.truncf %80 : vector<128x128xf32> to vector<128x128xbf16>
    %c3_59 = arith.constant 3 : index
    %c0_60 = arith.constant 0 : index
    %c0_61 = arith.constant 0 : index
    %82 = vector.load %arg6[%c3_59, %c0_60, %c0_61] : memref<5x128x128xbf16, #tpu.memory_space<vmem>>, vector<1x128x128xbf16>
    %83 = vector.shape_cast %82 : vector<1x128x128xbf16> to vector<128x128xbf16>
    %cst_62 = arith.constant dense<0.000000e+00> : vector<128x128xf32>
    %84 = tpu.matmul %81, %83, %cst_62 {dimension_numbers = #tpu.dot_dimension_numbers<[1], [0], [0], [1], [0, 0, 1, 1], [], []>} : vector<128x128xbf16>, vector<128x128xbf16>, vector<128x128xf32> -> vector<128x128xf32>
    %c3_63 = arith.constant 3 : index
    %c0_64 = arith.constant 0 : index
    %c0_65 = arith.constant 0 : index
    %85 = vector.load %arg7[%c3_63, %c0_64, %c0_65] : memref<5x1x128xf32, #tpu.memory_space<vmem>>, vector<1x1x128xf32>
    %86 = vector.shape_cast %85 : vector<1x1x128xf32> to vector<1x128xf32>
    %87 = vector.broadcast %86 : vector<1x128xf32> to vector<128x128xf32>
    %88 = arith.addf %84, %87 : vector<128x128xf32>
    %89 = arith.addf %68, %88 : vector<128x128xf32>
    %cst_66 = arith.constant 0.000000e+00 : f32
    %90 = vector.broadcast %cst_66 : f32 to vector<128x128xf32>
    %91 = arith.maximumf %89, %90 : vector<128x128xf32>
    %92 = arith.truncf %91 : vector<128x128xf32> to vector<128x128xbf16>
    %c4 = arith.constant 4 : index
    %c0_67 = arith.constant 0 : index
    %c0_68 = arith.constant 0 : index
    %93 = vector.load %arg4[%c4, %c0_67, %c0_68] : memref<5x128x128xbf16, #tpu.memory_space<vmem>>, vector<1x128x128xbf16>
    %94 = vector.shape_cast %93 : vector<1x128x128xbf16> to vector<128x128xbf16>
    %cst_69 = arith.constant dense<0.000000e+00> : vector<128x128xf32>
    %95 = tpu.matmul %92, %94, %cst_69 {dimension_numbers = #tpu.dot_dimension_numbers<[1], [0], [0], [1], [0, 0, 1, 1], [], []>} : vector<128x128xbf16>, vector<128x128xbf16>, vector<128x128xf32> -> vector<128x128xf32>
    %c4_70 = arith.constant 4 : index
    %c0_71 = arith.constant 0 : index
    %c0_72 = arith.constant 0 : index
    %96 = vector.load %arg5[%c4_70, %c0_71, %c0_72] : memref<5x1x128xf32, #tpu.memory_space<vmem>>, vector<1x1x128xf32>
    %97 = vector.shape_cast %96 : vector<1x1x128xf32> to vector<1x128xf32>
    %98 = vector.broadcast %97 : vector<1x128xf32> to vector<128x128xf32>
    %99 = arith.addf %95, %98 : vector<128x128xf32>
    %cst_73 = arith.constant 0.000000e+00 : f32
    %100 = vector.broadcast %cst_73 : f32 to vector<128x128xf32>
    %101 = arith.maximumf %99, %100 : vector<128x128xf32>
    %102 = arith.truncf %101 : vector<128x128xf32> to vector<128x128xbf16>
    %c4_74 = arith.constant 4 : index
    %c0_75 = arith.constant 0 : index
    %c0_76 = arith.constant 0 : index
    %103 = vector.load %arg6[%c4_74, %c0_75, %c0_76] : memref<5x128x128xbf16, #tpu.memory_space<vmem>>, vector<1x128x128xbf16>
    %104 = vector.shape_cast %103 : vector<1x128x128xbf16> to vector<128x128xbf16>
    %cst_77 = arith.constant dense<0.000000e+00> : vector<128x128xf32>
    %105 = tpu.matmul %102, %104, %cst_77 {dimension_numbers = #tpu.dot_dimension_numbers<[1], [0], [0], [1], [0, 0, 1, 1], [], []>} : vector<128x128xbf16>, vector<128x128xbf16>, vector<128x128xf32> -> vector<128x128xf32>
    %c4_78 = arith.constant 4 : index
    %c0_79 = arith.constant 0 : index
    %c0_80 = arith.constant 0 : index
    %106 = vector.load %arg7[%c4_78, %c0_79, %c0_80] : memref<5x1x128xf32, #tpu.memory_space<vmem>>, vector<1x1x128xf32>
    %107 = vector.shape_cast %106 : vector<1x1x128xf32> to vector<1x128xf32>
    %108 = vector.broadcast %107 : vector<1x128xf32> to vector<128x128xf32>
    %109 = arith.addf %105, %108 : vector<128x128xf32>
    %110 = arith.addf %89, %109 : vector<128x128xf32>
    %cst_81 = arith.constant 0.000000e+00 : f32
    %111 = vector.broadcast %cst_81 : f32 to vector<128x128xf32>
    %112 = arith.maximumf %110, %111 : vector<128x128xf32>
    %113 = arith.truncf %112 : vector<128x128xf32> to vector<128x128xbf16>
    %c0_82 = arith.constant 0 : index
    %c0_83 = arith.constant 0 : index
    %114 = vector.load %arg8[%c0_82, %c0_83] : memref<128x128xbf16, #tpu.memory_space<vmem>>, vector<128x128xbf16>
    %cst_84 = arith.constant dense<0.000000e+00> : vector<128x128xf32>
    %115 = tpu.matmul %113, %114, %cst_84 {dimension_numbers = #tpu.dot_dimension_numbers<[1], [0], [0], [1], [0, 0, 1, 1], [], []>} : vector<128x128xbf16>, vector<128x128xbf16>, vector<128x128xf32> -> vector<128x128xf32>
    %c0_85 = arith.constant 0 : index
    %c0_86 = arith.constant 0 : index
    %116 = vector.load %arg9[%c0_85, %c0_86] : memref<1x128xf32, #tpu.memory_space<vmem>>, vector<1x128xf32>
    %117 = vector.broadcast %116 : vector<1x128xf32> to vector<128x128xf32>
    %118 = arith.addf %115, %117 : vector<128x128xf32>
    %119 = vector.extract_strided_slice %118 {offsets = [0, 0], sizes = [128, 4], strides = [1, 1]} : vector<128x128xf32> to vector<128x4xf32>
    %c0_87 = arith.constant 0 : index
    %c0_88 = arith.constant 0 : index
    %120 = vector.load %arg10[%c0_87, %c0_88] : memref<128x4xf32, #tpu.memory_space<vmem>>, vector<128x4xf32>
    tpu.vector_store %arg10[%c0_87, %c0_88], %119 {strides = array<i32>} : memref<128x4xf32, #tpu.memory_space<vmem>>, vector<128x4xf32>,
    return
  }
  func.func @transform_0(%arg0: i32) -> (i32, i32) {
    %c0_i32 = arith.constant 0 : i32
    %c0_i32_0 = arith.constant 0 : i32
    return %arg0, %c0_i32 : i32, i32
  }
  func.func @transform_1(%arg0: i32) -> (i32, i32) {
    %c0_i32 = arith.constant 0 : i32
    %c0_i32_0 = arith.constant 0 : i32
    %c0_i32_1 = arith.constant 0 : i32
    return %c0_i32, %c0_i32_0 : i32, i32
  }
  func.func @transform_2(%arg0: i32) -> (i32, i32) {
    %c0_i32 = arith.constant 0 : i32
    %c0_i32_0 = arith.constant 0 : i32
    %c0_i32_1 = arith.constant 0 : i32
    return %c0_i32, %c0_i32_0 : i32, i32
  }
  func.func @transform_3(%arg0: i32) -> (i32, i32, i32) {
    %c0_i32 = arith.constant 0 : i32
    %c0_i32_0 = arith.constant 0 : i32
    %c0_i32_1 = arith.constant 0 : i32
    %c0_i32_2 = arith.constant 0 : i32
    return %c0_i32, %c0_i32_0, %c0_i32_1 : i32, i32, i32
  }
  func.func @transform_4(%arg0: i32) -> (i32, i32, i32) {
    %c0_i32 = arith.constant 0 : i32
    %c0_i32_0 = arith.constant 0 : i32
    %c0_i32_1 = arith.constant 0 : i32
    %c0_i32_2 = arith.constant 0 : i32
    return %c0_i32, %c0_i32_0, %c0_i32_1 : i32, i32, i32
  }
  func.func @transform_5(%arg0: i32) -> (i32, i32, i32) {
    %c0_i32 = arith.constant 0 : i32
    %c0_i32_0 = arith.constant 0 : i32
    %c0_i32_1 = arith.constant 0 : i32
    %c0_i32_2 = arith.constant 0 : i32
    return %c0_i32, %c0_i32_0, %c0_i32_1 : i32, i32, i32
  }
  func.func @transform_6(%arg0: i32) -> (i32, i32, i32) {
    %c0_i32 = arith.constant 0 : i32
    %c0_i32_0 = arith.constant 0 : i32
    %c0_i32_1 = arith.constant 0 : i32
    %c0_i32_2 = arith.constant 0 : i32
    return %c0_i32, %c0_i32_0, %c0_i32_1 : i32, i32, i32
  }
  func.func @transform_7(%arg0: i32) -> (i32, i32) {
    %c0_i32 = arith.constant 0 : i32
    %c0_i32_0 = arith.constant 0 : i32
    %c0_i32_1 = arith.constant 0 : i32
    return %c0_i32, %c0_i32_0 : i32, i32
  }
  func.func @transform_8(%arg0: i32) -> (i32, i32) {
    %c0_i32 = arith.constant 0 : i32
    %c0_i32_0 = arith.constant 0 : i32
    %c0_i32_1 = arith.constant 0 : i32
    return %c0_i32, %c0_i32_0 : i32, i32
  }
  func.func @transform_9(%arg0: i32) -> (i32, i32) {
    %c0_i32 = arith.constant 0 : i32
    %c0_i32_0 = arith.constant 0 : i32
    return %arg0, %c0_i32 : i32, i32
  }
}

</mosaic_0001>

<bundles_post_ra>
// kernel: tpu_custom_call.1
= control target key start
LH: loop header
LB: loop body
LE: loop exit
PB: predicated region body
PF: predicated region fallthrough
CT: control target
= control target key end

     0   :  { %14 = vsyncpa [#allocation3], 0  ;;  %s4477_s0 = inlined_call_operand.vmem [shape: bf16[256,16], index: 0, kind: input, shape index: {}]   ;;  %s4478_s1 = inlined_call_operand.vmem [shape: bf16[16,128], index: 1, kind: input, shape index: {}]   ;;  %s4479_s2 = inlined_call_operand.vmem [shape: f32[1,128], index: 2, kind: input, shape index: {}]   ;;  %s4480_s3 = inlined_call_operand.hbm [shape: bf16[5,128,128], index: 3, kind: input, shape index: {}]   ;;  %s4481_s4 = inlined_call_operand.vmem [shape: f32[5,1,128], index: 4, kind: input, shape index: {}]   ;;  %s4482_s5 = inlined_call_operand.hbm [shape: bf16[5,128,128], index: 5, kind: input, shape index: {}]   ;;  %s4483_s6 = inlined_call_operand.vmem [shape: f32[5,1,128], index: 6, kind: input, shape index: {}]   ;;  %s4484_s7 = inlined_call_operand.vmem [shape: bf16[128,128], index: 7, kind: input, shape index: {}]   ;;  %s4485_s8 = inlined_call_operand.vmem [shape: f32[1,128], index: 8, kind: input, shape index: {}]   ;;  %s4486_s9 = inlined_call_operand.vmem [shape: f32[256,4], index: 9, kind: output, shape index: {}]  }
   0x1   :  { %15 = vsyncpa [#allocation5], 0  ;;  %s3828_s30 = smov 0  }
   0x2 LB: > { %s2863_s10 = sadd.s32 4294967295, %s3772_s30   ;;  %p2865_p0 = scmp.ge.s32.totalorder %s3772_s30, 1  ;;  %s3772_s30 = sphi %s3828_s30, %s21_s30  }
   0x3   : > { %p246_p1 = scmp.lt.s32.totalorder %s3772_s30, 3  ;;  %s3774_s11 = smov [#allocation2]  }
   0x4   : > { %s264_s12 = sshll.u32 %s3774_s11, 4  ;;  %p3842_p3 = scmp.eq.s32.totalorder %s2863_s10, 0  ;;  %s265_s12 = int_to_ptr.vmem [resolvable:$true] %s264_s12 }
   0x5   : > { %p3836_p2 = pnand %p2865_p0, %p246_p1  ;;  %s3775_s15 = smov [#allocation4]  }
   0x6   : > { %s4491_s14 = scalar_select %p3842_p3, 1, 0 }
   0x7   : > { %s4490_s13 = scalar_select %p3836_p2, 1, 0 }
   0x8   : > { %p3582_p4 = pneg %p3836_p2  ;;  %s280_s16 = sshll.u32 %s3775_s15, 4  ;;  %s3854_s16 = int_to_ptr.vmem [resolvable:$true] %s280_s16 }
   0x9   : > { %s3702_s20 = scalar_lea.hbm %s4480_s3, 5120 }
   0xa   : > { %p3850_p5 = pnand %p3842_p3, %p3582_p4  ;;  %p3703_p6 = scmp.ne.s32.totalorder %s4480_s3, %s3702_s20 }
   0xb   : > { %p3709_p10 = scmp.lt.u32.totalorder %s3702_s20, %s4480_s3 }
   0xc   : > { %p3704_p7 = pneg %p3850_p5 }
   0xe   : > { %p3705_p8 = pnand %p3704_p7, %p3703_p6 }
  0x10   : > { %p3706_p9 = pneg %p3705_p8 }
  0x12   : > { %p3711_p11 = pnand %p3709_p10, %p3706_p9 }
  0x14   : > { %3714 = shalt.err (!%p3711_p11)
}
  0x15   : > { %s3715_s25 = scalar_lea.vmem %s265_s12, 5120  ;;  %p3723_p1 = scmp.lt.s32.totalorder %s265_s12, %s265_s12 }
  0x16   : > { %p3716_p12 = scmp.ne.s32.totalorder %s265_s12, %s3715_s25  ;;  %p3724_p4 = scmp.lt.s32.totalorder %s3715_s25, %s3715_s25 }
  0x18   : > { %p3718_p13 = pnand %p3716_p12, %p3704_p7  ;;  %p3725_p3 = por %p3724_p4, %p3723_p1 }
  0x1a   : > { %p3719_p0 = pneg %p3718_p13 }
  0x1c   : > { %p3726_p2 = pnand %p3725_p3, %p3719_p0 }
  0x1e   : > { %3729 = shalt.err (!%p3726_p2)
}
  0x1f   : > { %s3776_s26 = smov 64   ;;  %s3777_s27 = smov 4  }
  0x20   : > { %3585 = dma.hbm_to_vmem [thread:$0]  (!%p3850_p5), %s4480_s3, 5120, %s265_s12, [#allocation3], %s3776_s26, %s3776_s26, %s3777_s27  }
  0x21   : > { %s3730_s18 = scalar_lea.hbm %s4482_s5, 5120 }
  0x22   : > { %p3731_p6 = scmp.ne.s32.totalorder %s4482_s5, %s3730_s18  ;;  %p3737_p8 = scmp.lt.u32.totalorder %s3730_s18, %s4482_s5 }
  0x24   : > { %p3733_p2 = pnand %p3731_p6, %p3704_p7 }
  0x26   : > { %p3734_p3 = pneg %p3733_p2 }
  0x28   : > { %p3739_p9 = pnand %p3737_p8, %p3734_p3 }
  0x2a   : > { %3742 = shalt.err (!%p3739_p9)
}
  0x2b   : > { %s3743_s12 = scalar_lea.vmem %s3854_s16, 5120  ;;  %p3751_p13 = scmp.lt.s32.totalorder %s3854_s16, %s3854_s16 }
  0x2c   : > { %p3744_p10 = scmp.ne.s32.totalorder %s3854_s16, %s3743_s12  ;;  %p3752_p0 = scmp.lt.s32.totalorder %s3743_s12, %s3743_s12 }
  0x2e   : > { %p3746_p11 = pnand %p3744_p10, %p3704_p7  ;;  %p3753_p1 = por %p3752_p0, %p3751_p13 }
  0x30   : > { %p3747_p12 = pneg %p3746_p11 }
  0x32   : > { %p3754_p4 = pnand %p3753_p1, %p3747_p12 }
  0x34   : > { %3757 = shalt.err (!%p3754_p4)
}
  0x35   : > { %3588 = dma.hbm_to_vmem [thread:$0]  (!%p3850_p5), %s4482_s5, 5120, %s3854_s16, [#allocation5], %s3776_s26, %s3776_s26, %s3777_s27  }
  0x36   : > { %p4493_p6 = scmp.ne.s32.totalorder %s4490_s13, 0 }
  0x37   : > { %p4494_p2 = scmp.ne.s32.totalorder (!%p4493_p6), %s4491_s14, 0 }
  0x38   : > { %314 = sbr.rel (%p4493_p6) target bundleno = 2768 (0xad0), region = 56 }
  0x3f   : > { %3763 = dma.done.wait (%p4494_p2), [#allocation3], 5120  }
  0x40   : > { %3765 = vsyncadd (%p4494_p2), [#allocation3], 4294962176 }
  0x41   : > { %3767 = dma.done.wait (%p4494_p2), [#allocation5], 5120  }
  0x42   : > { %3769 = vsyncadd (%p4494_p2), [#allocation5], 4294962176  ;;  %s2872_s17 = sshll.u32 %s2863_s10, 4  ;;  %v3605_v0 = vld [vmem:[%s4478_s1] sm:$0xff]   ;;  %vm438_vm0 = vcmask 130048   ;;  %v3615_v6 = vld [vmem:[#allocation2 + $0x8] sm:$0xff]  }
  0x43   : > { %p355_p7 = scmp.lt.s32.totalorder %s2872_s17, 31  ;;  %3188 = vmatprep.subr.bf16.mxu0 %v3605_v0  ;;  %v3614_v5 = vld [vmem:[#allocation2] sm:$0xff]   ;;  %v3616_v8 = vld [vmem:[#allocation2 + $0x10] sm:$0xff]   ;;  %v3617_v9 = vld [vmem:[#allocation2 + $0x18] sm:$0xff]   ;;  %vm2768_vm1 = vcmask 31744  }
  0x44   : > { %3189 = vmatpush3.bf16.msra.mxu0 %v3605_v0  ;;  %3206 = vmatprep.subr.bf16.mxu1 %v3614_v5  ;;  %v3618_v12 = vld [vmem:[#allocation2 + $0x20] sm:$0xff]   ;;  %v3619_v13 = vld [vmem:[#allocation2 + $0x28] sm:$0xff]   ;;  %v3620_v15 = vld [vmem:[#allocation2 + $0x30] sm:$0xff]  }
  0x45   : > { %s4496_s17 = smov (!%p355_p7, %s2872_s17), 31  ;;  %3207 = vmatpush3.bf16.msra.mxu1 %v3614_v5  ;;  %v3621_v16 = vld [vmem:[#allocation2 + $0x38] sm:$0xff]   ;;  %v3622_v17 = vld [vmem:[#allocation4] sm:$0xff]   ;;  %v3623_v18 = vld [vmem:[#allocation4 + $0x8] sm:$0xff]  }
  0x46   : > { %s2873_s13 = sshll.u32 %s4496_s17, 2  ;;  %3208 = vmatprep.subr.bf16.mxu1 %v3615_v6  ;;  %3238 = vmatprep.subr.bf16.mxu0 %v3622_v17  ;;  %v3624_v19 = vld [vmem:[#allocation4 + $0x10] sm:$0xff]   ;;  %v3625_v20 = vld [vmem:[#allocation4 + $0x18] sm:$0xff]   ;;  %v3626_v21 = vld [vmem:[#allocation4 + $0x20] sm:$0xff]   ;;  %s2875_s10 = sshll.u32 %s4496_s17, 3 }
  0x47   : > { %s3921_s26 = scalar_lea.vmem %s4477_s0, %s2873_s13  ;;  %v3627_v22 = vld [vmem:[#allocation4 + $0x28] sm:$0xff]   ;;  %v2876_v23 = vld [vmem:[%s4479_s2] ss:$0 sm:$0xff]  ;;  %s4440_s18 = scalar_lea.vmem %s4486_s9, %s2875_s10 }
  0x48   : > { %v3606_v1 = vld [vmem:[%s3921_s26] sm:$0xff]   ;;  %v3607_v2 = vld [vmem:[%s3921_s26 + $0x8] sm:$0xff]   ;;  %v3608_v3 = vld [vmem:[%s3921_s26 + $0x10] sm:$0xff]  }
  0x49   : > { %3190 = vmatprep.mubr.msk.bf16.mxu0 %vm438_vm0, %v3606_v1  ;;  %v3609_v4 = vld [vmem:[%s3921_s26 + $0x18] sm:$0xff]   ;;  %v3610_v7 = vld [vmem:[%s3921_s26 + $0x20] sm:$0xff]   ;;  %v3611_v10 = vld [vmem:[%s3921_s26 + $0x28] sm:$0xff]   ;;  %3209 = vmatpush3.bf16.msra.mxu1 %v3615_v6 }
  0x4a   : > { %3191 = vmatmul.mubr.msk.bf16.vlgmr.msra.gmra.mrb[0].mxu0 %vm438_vm0, %v3607_v2  ;;  %v3612_v11 = vld [vmem:[%s3921_s26 + $0x30] sm:$0xff]   ;;  %3210 = vmatprep.subr.bf16.mxu1 %v3616_v8  ;;  %v3613_v14 = vld [vmem:[%s3921_s26 + $0x38] sm:$0xff]  }
  0x4b   : > { %3194 = vmatprep.mubr.msk.bf16.mxu0 %vm438_vm0, %v3608_v3  ;;  %3239 = vmatpush3.bf16.msra.mxu0 %v3622_v17  ;;  %v3629_v17 = vld [vmem:[#allocation4 + $0x38] sm:$0xff]  }
  0x4c   : > { %3240 = vmatprep.subr.bf16.mxu0 %v3623_v18 }
  0x4d   : > { %3211 = vmatpush3.bf16.msra.mxu1 %v3616_v8 }
  0x4e   : > { %3212 = vmatprep.subr.bf16.mxu1 %v3617_v9 }
  0x4f   : > { %3241 = vmatpush3.bf16.msra.mxu0 %v3623_v18  ;;  %v3630_v18 = vld [vmem:[#allocation2 + $0x40] sm:$0xff]  }
  0x50   : > { %3242 = vmatprep.subr.bf16.mxu0 %v3624_v19 }
  0x51   : > { %3213 = vmatpush3.bf16.msra.mxu1 %v3617_v9 }
  0x52   : > { %3195 = vmatmul.mubr.msk.bf16.gmra.mrb[4].mxu0 %vm438_vm0, %v3609_v4  ;;  %3214 = vmatprep.subr.bf16.mxu1 %v3618_v12 }
  0x53   : > { %3198 = vmatprep.mubr.msk.bf16.mxu0 %vm438_vm0, %v3610_v7  ;;  %3243 = vmatpush3.bf16.msra.mxu0 %v3624_v19  ;;  %v3631_v19 = vld [vmem:[#allocation2 + $0x48] sm:$0xff]  }
  0x54   : > { %3244 = vmatprep.subr.bf16.mxu0 %v3625_v20 }
  0x55   : > { %3215 = vmatpush3.bf16.msra.mxu1 %v3618_v12 }
  0x56   : > { %3216 = vmatprep.subr.bf16.mxu1 %v3619_v13 }
  0x57   : > { %3245 = vmatpush3.bf16.msra.mxu0 %v3625_v20  ;;  %v3632_v20 = vld [vmem:[#allocation2 + $0x50] sm:$0xff]  }
  0x58   : > { %3246 = vmatprep.subr.bf16.mxu0 %v3626_v21 }
  0x59   : > { %3217 = vmatpush3.bf16.msra.mxu1 %v3619_v13 }
  0x5a   : > { %3199 = vmatmul.mubr.msk.bf16.gmra.mrb[8].mxu0 %vm438_vm0, %v3611_v10  ;;  %3218 = vmatprep.subr.bf16.mxu1 %v3620_v15 }
  0x5b   : > { %3202 = vmatprep.mubr.msk.bf16.mxu0 %vm438_vm0, %v3612_v11  ;;  %3247 = vmatpush3.bf16.msra.mxu0 %v3626_v21  ;;  %v3633_v21 = vld [vmem:[#allocation2 + $0x58] sm:$0xff]  }
  0x5c   : > { %3248 = vmatprep.subr.bf16.mxu0 %v3627_v22 }
  0x5d   : > { %3219 = vmatpush3.bf16.msra.mxu1 %v3620_v15 }
  0x5e   : > { %3220 = vmatprep.subr.bf16.mxu1 %v3621_v16 }
  0x5f   : > { %3249 = vmatpush3.bf16.msra.mxu0 %v3627_v22  ;;  %v3634_v22 = vld [vmem:[#allocation2 + $0x60] sm:$0xff]  }
  0x61   : > { %3221 = vmatpush3.bf16.msra.mxu1 %v3621_v16  ;;  %v3628_v16 = vld [vmem:[#allocation4 + $0x30] sm:$0xff]  }
  0x62   : > { %3203 = vmatmul.mubr.msk.bf16.gmra.mrb[12].mxu0 %vm438_vm0, %v3613_v14  ;;  %3250 = vmatprep.subr.bf16.mxu0 %v3628_v16 }
  0x63   : > { %3251 = vmatpush3.bf16.msra.mxu0 %v3628_v16  ;;  %3270 = vmatprep.subr.bf16.mxu1 %v3630_v18 }
  0x64   : > { %3252 = vmatprep.subr.bf16.mxu0 %v3629_v17 }
  0x67   : > { %3253 = vmatpush3.bf16.msra.mxu0 %v3629_v17 }
 0x11d   : > { %v3192_v24 = vpop.f32.mrb[0].mxu0 }
 0x11e   : > { %v497_v25 = vpop.f32.mrb[1].mxu0  ;;  %v3947_v28 = vadd.f32 %v3192_v24, %v2876_v23 }
 0x11f   : > { %v3945_v26 = vadd.f32 %v2876_v23, %v497_v25  ;;  %v3193_v27 = vpop.f32.mrb[2].mxu0 }
 0x120   : > { %v3949_v29 = vadd.f32 %v3193_v27, %v2876_v23  ;;  %v500_v30 = vpop.f32.mrb[3].mxu0  ;;  %v562_v35 = vmax.f32 %v3947_v28, 0.0 }
 0x121   : > { %v3951_v31 = vadd.f32 %v2876_v23, %v500_v30  ;;  %v560_v33 = vmax.f32 %v3945_v26, 0.0 }
 0x122   : > { %v563_v32 = vmax.f32 %v3949_v29, 0.0 }
 0x123   : > { %v561_v34 = vmax.f32 %v3951_v31, 0.0 }
 0x124   : > { %v577_v39 = vpack.c.bf16 %v563_v32, %v562_v35 }
 0x125   : > { %v3196_v36 = vpop.f32.mrb[4].mxu0  ;;  %v576_v37 = vpack.c.bf16 %v561_v34, %v560_v33 }
 0x126   : > { %v513_v38 = vpop.f32.mrb[5].mxu0  ;;  %v3959_v42 = vadd.f32 %v3196_v36, %v2876_v23 }
 0x127   : > { %v3957_v40 = vadd.f32 %v2876_v23, %v513_v38  ;;  %v3197_v41 = vpop.f32.mrb[6].mxu0  ;;  %3222 = vmatprep.mubr.bf16.mxu1 %v576_v37 }
 0x128   : > { %v3961_v43 = vadd.f32 %v3197_v41, %v2876_v23  ;;  %v516_v44 = vpop.f32.mrb[7].mxu0  ;;  %3223 = vmatmul.mubr.bf16.vlgmr.msra.gmra.mrb[0].mxu1 %v577_v39  ;;  %v566_v49 = vmax.f32 %v3959_v42, 0.0 }
 0x129   : > { %v3963_v45 = vadd.f32 %v2876_v23, %v516_v44  ;;  %v564_v47 = vmax.f32 %v3957_v40, 0.0  ;;  %3271 = vmatpush3.bf16.msra.mxu1 %v3630_v18 }
 0x12a   : > { %v567_v46 = vmax.f32 %v3961_v43, 0.0  ;;  %3272 = vmatprep.subr.bf16.mxu1 %v3631_v19 }
 0x12b   : > { %v565_v48 = vmax.f32 %v3963_v45, 0.0 }
 0x12c   : > { %v579_v53 = vpack.c.bf16 %v567_v46, %v566_v49 }
 0x12d   : > { %v3200_v50 = vpop.f32.mrb[8].mxu0  ;;  %v578_v51 = vpack.c.bf16 %v565_v48, %v564_v47  ;;  %3273 = vmatpush3.bf16.msra.mxu1 %v3631_v19 }
 0x12e   : > { %v529_v52 = vpop.f32.mrb[9].mxu0  ;;  %v3971_v56 = vadd.f32 %v3200_v50, %v2876_v23  ;;  %3274 = vmatprep.subr.bf16.mxu1 %v3632_v20 }
 0x12f   : > { %v3969_v54 = vadd.f32 %v2876_v23, %v529_v52  ;;  %v3201_v55 = vpop.f32.mrb[10].mxu0  ;;  %3226 = vmatprep.mubr.bf16.mxu1 %v578_v51 }
 0x130   : > { %v3973_v57 = vadd.f32 %v3201_v55, %v2876_v23  ;;  %v532_v58 = vpop.f32.mrb[11].mxu0  ;;  %3227 = vmatmul.mubr.bf16.gmra.mrb[4].mxu1 %v579_v53  ;;  %v570_v63 = vmax.f32 %v3971_v56, 0.0 }
 0x131   : > { %v3975_v59 = vadd.f32 %v2876_v23, %v532_v58  ;;  %v568_v61 = vmax.f32 %v3969_v54, 0.0  ;;  %3275 = vmatpush3.bf16.msra.mxu1 %v3632_v20 }
 0x132   : > { %v571_v60 = vmax.f32 %v3973_v57, 0.0  ;;  %3276 = vmatprep.subr.bf16.mxu1 %v3633_v21 }
 0x133   : > { %v569_v62 = vmax.f32 %v3975_v59, 0.0 }
 0x134   : > { %v581_v3 = vpack.c.bf16 %v571_v60, %v570_v63 }
 0x135   : > { %v3204_v0 = vpop.f32.mrb[12].mxu0  ;;  %v580_v1 = vpack.c.bf16 %v569_v62, %v568_v61  ;;  %3277 = vmatpush3.bf16.msra.mxu1 %v3633_v21 }
 0x136   : > { %v545_v2 = vpop.f32.mrb[13].mxu0  ;;  %v3983_v6 = vadd.f32 %v3204_v0, %v2876_v23  ;;  %3278 = vmatprep.subr.bf16.mxu1 %v3634_v22 }
 0x137   : > { %v3981_v4 = vadd.f32 %v2876_v23, %v545_v2  ;;  %v3205_v5 = vpop.f32.mrb[14].mxu0  ;;  %3230 = vmatprep.mubr.bf16.mxu1 %v580_v1 }
 0x138   : > { %v3985_v7 = vadd.f32 %v3205_v5, %v2876_v23  ;;  %v548_v8 = vpop.f32.mrb[15].mxu0  ;;  %3231 = vmatmul.mubr.bf16.gmra.mrb[8].mxu1 %v581_v3  ;;  %v574_v13 = vmax.f32 %v3983_v6, 0.0 }
 0x139   : > { %v3987_v9 = vadd.f32 %v2876_v23, %v548_v8  ;;  %v572_v11 = vmax.f32 %v3981_v4, 0.0  ;;  %3279 = vmatpush3.bf16.msra.mxu1 %v3634_v22  ;;  %v2894_v23 = vld [vmem:[%s4481_s4] ss:$0 sm:$0xff] }
 0x13a   : > { %v575_v10 = vmax.f32 %v3985_v7, 0.0 }
 0x13b   : > { %v573_v12 = vmax.f32 %v3987_v9, 0.0 }
 0x13c   : > { %v583_v15 = vpack.c.bf16 %v575_v10, %v574_v13 }
 0x13d   : > { %v582_v14 = vpack.c.bf16 %v573_v12, %v572_v11 }
 0x13f   : > { %3234 = vmatprep.mubr.bf16.mxu1 %v582_v14 }
 0x140   : > { %3235 = vmatmul.mubr.bf16.gmra.mrb[12].mxu1 %v583_v15 }
 0x1fb   : > { %v3224_v24 = vpop.f32.mrb[0].mxu1 }
 0x1fc   : > { %v698_v25 = vadd.f32 %v3224_v24, %v2894_v23  ;;  %v689_v27 = vpop.f32.mrb[1].mxu1 }
 0x1fd   : > { %v690_v30 = vadd.f32 %v2894_v23, %v689_v27  ;;  %v3225_v32 = vpop.f32.mrb[2].mxu1 }
 0x1fe   : > { %v701_v33 = vadd.f32 %v3225_v32, %v2894_v23  ;;  %v692_v34 = vpop.f32.mrb[3].mxu1  ;;  %v754_v36 = vmax.f32 %v698_v25, 0.0 }
 0x1ff   : > { %v693_v35 = vadd.f32 %v2894_v23, %v692_v34  ;;  %v752_v38 = vmax.f32 %v690_v30, 0.0 }
 0x200   : > { %v755_v37 = vmax.f32 %v701_v33, 0.0 }
 0x201   : > { %v753_v39 = vmax.f32 %v693_v35, 0.0 }
 0x202   : > { %v769_v41 = vpack.c.bf16 %v755_v37, %v754_v36  ;;  %v3635_v37 = vld [vmem:[#allocation2 + $0x68] sm:$0xff]  }
 0x203   : > { %v768_v44 = vpack.c.bf16 %v753_v39, %v752_v38  ;;  %v3228_v46 = vpop.f32.mrb[4].mxu1  ;;  %3280 = vmatprep.subr.bf16.mxu1 %v3635_v37  ;;  %v3636_v38 = vld [vmem:[#allocation2 + $0x70] sm:$0xff]   ;;  %v3637_v39 = vld [vmem:[#allocation2 + $0x78] sm:$0xff]  }
 0x204   : > { %v714_v47 = vadd.f32 %v3228_v46, %v2894_v23  ;;  %v705_v48 = vpop.f32.mrb[5].mxu1  ;;  %3281 = vmatpush3.bf16.msra.mxu1 %v3635_v37  ;;  %v3641_v46 = vld [vmem:[#allocation4 + $0x58] sm:$0xff]  }
 0x205   : > { %v706_v49 = vadd.f32 %v2894_v23, %v705_v48  ;;  %v3229_v50 = vpop.f32.mrb[6].mxu1  ;;  %3254 = vmatprep.mubr.bf16.mxu0 %v768_v44  ;;  %3282 = vmatprep.subr.bf16.mxu1 %v3636_v38  ;;  %v3639_v44 = vld [vmem:[#allocation4 + $0x48] sm:$0xff]  }
 0x206   : > { %v717_v51 = vadd.f32 %v3229_v50, %v2894_v23  ;;  %v708_v52 = vpop.f32.mrb[7].mxu1  ;;  %3255 = vmatmul.mubr.bf16.vlgmr.msra.gmra.mrb[16].mxu0 %v769_v41  ;;  %v758_v55 = vmax.f32 %v714_v47, 0.0  ;;  %v3638_v41 = vld [vmem:[#allocation4 + $0x40] sm:$0xff]   ;;  %v3643_v48 = vld [vmem:[#allocation4 + $0x68] sm:$0xff]  }
 0x207   : > { %v709_v53 = vadd.f32 %v2894_v23, %v708_v52  ;;  %v756_v60 = vmax.f32 %v706_v49, 0.0  ;;  %3302 = vmatprep.subr.bf16.mxu0 %v3638_v41  ;;  %v3642_v47 = vld [vmem:[#allocation4 + $0x60] sm:$0xff]  }
 0x208   : > { %v759_v58 = vmax.f32 %v717_v51, 0.0  ;;  %3283 = vmatpush3.bf16.msra.mxu1 %v3636_v38  ;;  %3303 = vmatpush3.bf16.msra.mxu0 %v3638_v41  ;;  %v3999_v49 = vld [vmem:[%s4483_s6] ss:$0 sm:$0xff] }
 0x209   : > { %v757_v61 = vmax.f32 %v709_v53, 0.0  ;;  %3284 = vmatprep.subr.bf16.mxu1 %v3637_v39  ;;  %3304 = vmatprep.subr.bf16.mxu0 %v3639_v44 }
 0x20a   : > { %v771_v62 = vpack.c.bf16 %v759_v58, %v758_v55 }
 0x20b   : > { %v770_v63 = vpack.c.bf16 %v757_v61, %v756_v60  ;;  %v3232_v0 = vpop.f32.mrb[8].mxu1 }
 0x20c   : > { %v730_v1 = vadd.f32 %v3232_v0, %v2894_v23  ;;  %v721_v2 = vpop.f32.mrb[9].mxu1  ;;  %3285 = vmatpush3.bf16.msra.mxu1 %v3637_v39  ;;  %3305 = vmatpush3.bf16.msra.mxu0 %v3639_v44 }
 0x20d   : > { %v722_v3 = vadd.f32 %v2894_v23, %v721_v2  ;;  %v3233_v5 = vpop.f32.mrb[10].mxu1  ;;  %3258 = vmatprep.mubr.bf16.mxu0 %v770_v63 }
 0x20e   : > { %v733_v8 = vadd.f32 %v3233_v5, %v2894_v23  ;;  %v724_v10 = vpop.f32.mrb[11].mxu1  ;;  %3259 = vmatmul.mubr.bf16.gmra.mrb[20].mxu0 %v771_v62  ;;  %v762_v12 = vmax.f32 %v730_v1, 0.0 }
 0x20f   : > { %v725_v11 = vadd.f32 %v2894_v23, %v724_v10  ;;  %v760_v14 = vmax.f32 %v722_v3, 0.0 }
 0x210   : > { %v763_v13 = vmax.f32 %v733_v8, 0.0 }
 0x211   : > { %v761_v15 = vmax.f32 %v725_v11, 0.0 }
 0x212   : > { %v773_v16 = vpack.c.bf16 %v763_v13, %v762_v12 }
 0x213   : > { %v772_v17 = vpack.c.bf16 %v761_v15, %v760_v14  ;;  %v3236_v18 = vpop.f32.mrb[12].mxu1 }
 0x214   : > { %v746_v19 = vadd.f32 %v3236_v18, %v2894_v23  ;;  %v737_v20 = vpop.f32.mrb[13].mxu1 }
 0x215   : > { %v738_v21 = vadd.f32 %v2894_v23, %v737_v20  ;;  %v3237_v22 = vpop.f32.mrb[14].mxu1  ;;  %3262 = vmatprep.mubr.bf16.mxu0 %v772_v17 }
 0x216   : > { %v749_v24 = vadd.f32 %v3237_v22, %v2894_v23  ;;  %v740_v25 = vpop.f32.mrb[15].mxu1  ;;  %3263 = vmatmul.mubr.bf16.gmra.mrb[24].mxu0 %v773_v16  ;;  %v766_v30 = vmax.f32 %v746_v19, 0.0 }
 0x217   : > { %v741_v27 = vadd.f32 %v2894_v23, %v740_v25  ;;  %v764_v33 = vmax.f32 %v738_v21, 0.0  ;;  %v3640_v23 = vld [vmem:[#allocation4 + $0x50] sm:$0xff]  }
 0x218   : > { %v767_v32 = vmax.f32 %v749_v24, 0.0  ;;  %3306 = vmatprep.subr.bf16.mxu0 %v3640_v23 }
 0x219   : > { %v765_v34 = vmax.f32 %v741_v27, 0.0  ;;  %3307 = vmatpush3.bf16.msra.mxu0 %v3640_v23 }
 0x21a   : > { %v775_v35 = vpack.c.bf16 %v767_v32, %v766_v30  ;;  %3308 = vmatprep.subr.bf16.mxu0 %v3641_v46 }
 0x21b   : > { %v774_v36 = vpack.c.bf16 %v765_v34, %v764_v33 }
 0x21d   : > { %3266 = vmatprep.mubr.bf16.mxu0 %v774_v36  ;;  %3309 = vmatpush3.bf16.msra.mxu0 %v3641_v46 }
 0x21e   : > { %3267 = vmatmul.mubr.bf16.gmra.mrb[28].mxu0 %v775_v35  ;;  %3310 = vmatprep.subr.bf16.mxu0 %v3642_v47 }
 0x221   : > { %3311 = vmatpush3.bf16.msra.mxu0 %v3642_v47 }
 0x222   : > { %3312 = vmatprep.subr.bf16.mxu0 %v3643_v48 }
 0x225   : > { %3313 = vmatpush3.bf16.msra.mxu0 %v3643_v48 }
 0x2d9   : > { %v3256_v50 = vpop.f32.mrb[16].mxu0 }
 0x2da   : > { %v890_v51 = vadd.f32 %v3256_v50, %v3999_v49  ;;  %v881_v52 = vpop.f32.mrb[17].mxu0 }
 0x2db   : > { %v882_v53 = vadd.f32 %v3999_v49, %v881_v52  ;;  %v3257_v55 = vpop.f32.mrb[18].mxu0 }
 0x2dc   : > { %v893_v58 = vadd.f32 %v3257_v55, %v3999_v49  ;;  %v884_v60 = vpop.f32.mrb[19].mxu0  ;;  %v4009_v63 = vadd.f32 %v890_v51, %v3947_v28 }
 0x2dd   : > { %v4005_v61 = vadd.f32 %v882_v53, %v3945_v26  ;;  %v885_v62 = vadd.f32 %v3999_v49, %v884_v60 }
 0x2de   : > { %v4012_v0 = vadd.f32 %v893_v58, %v3949_v29  ;;  %v962_v26 = vmax.f32 %v4009_v63, 0.0 }
 0x2df   : > { %v4015_v1 = vadd.f32 %v885_v62, %v3951_v31  ;;  %v960_v3 = vmax.f32 %v4005_v61, 0.0 }
 0x2e0   : > { %v963_v2 = vmax.f32 %v4012_v0, 0.0 }
 0x2e1   : > { %v961_v5 = vmax.f32 %v4015_v1, 0.0  ;;  %v3260_v8 = vpop.f32.mrb[20].mxu0 }
 0x2e2   : > { %v906_v10 = vadd.f32 %v3260_v8, %v3999_v49  ;;  %v897_v11 = vpop.f32.mrb[21].mxu0  ;;  %v977_v13 = vpack.c.bf16 %v963_v2, %v962_v26  ;;  %v3647_v8 = vld [vmem:[#allocation2 + $0x88] sm:$0xff]   ;;  %v3648_v26 = vld [vmem:[#allocation2 + $0x90] sm:$0xff]  }
 0x2e3   : > { %v898_v28 = vadd.f32 %v3999_v49, %v897_v11  ;;  %v3261_v12 = vpop.f32.mrb[22].mxu0  ;;  %v976_v29 = vpack.c.bf16 %v961_v5, %v960_v3  ;;  %v3650_v11 = vld [vmem:[#allocation2 + $0xa0] sm:$0xff]  }
 0x2e4   : > { %v909_v31 = vadd.f32 %v3261_v12, %v3999_v49  ;;  %v900_v14 = vpop.f32.mrb[23].mxu0  ;;  %v4029_v17 = vadd.f32 %v906_v10, %v3959_v42  ;;  %v3649_v10 = vld [vmem:[#allocation2 + $0x98] sm:$0xff]  }
 0x2e5   : > { %v4025_v15 = vadd.f32 %v898_v28, %v3957_v40  ;;  %v901_v16 = vadd.f32 %v3999_v49, %v900_v14  ;;  %3286 = vmatprep.mubr.bf16.mxu1 %v976_v29  ;;  %v2913_v28 = vld [vmem:[%s4481_s4 + $0x1] ss:$0 sm:$0xff] }
 0x2e6   : > { %v4032_v18 = vadd.f32 %v909_v31, %v3961_v43  ;;  %3287 = vmatmul.mubr.bf16.vlgmr.msra.gmra.mrb[16].mxu1 %v977_v13  ;;  %v966_v24 = vmax.f32 %v4029_v17, 0.0 }
 0x2e7   : > { %v4035_v19 = vadd.f32 %v901_v16, %v3963_v45  ;;  %v964_v21 = vmax.f32 %v4025_v15, 0.0 }
 0x2e8   : > { %v967_v20 = vmax.f32 %v4032_v18, 0.0 }
 0x2e9   : > { %v965_v40 = vmax.f32 %v4035_v19, 0.0  ;;  %v3264_v22 = vpop.f32.mrb[24].mxu0 }
 0x2ea   : > { %v922_v25 = vadd.f32 %v3264_v22, %v3999_v49  ;;  %v913_v42 = vpop.f32.mrb[25].mxu0  ;;  %v979_v33 = vpack.c.bf16 %v967_v20, %v966_v24 }
 0x2eb   : > { %v914_v27 = vadd.f32 %v3999_v49, %v913_v42  ;;  %v3265_v43 = vpop.f32.mrb[26].mxu0  ;;  %v978_v30 = vpack.c.bf16 %v965_v40, %v964_v21 }
 0x2ec   : > { %v925_v32 = vadd.f32 %v3265_v43, %v3999_v49  ;;  %v916_v45 = vpop.f32.mrb[27].mxu0  ;;  %v4049_v36 = vadd.f32 %v922_v25, %v3971_v56 }
 0x2ed   : > { %v4045_v34 = vadd.f32 %v914_v27, %v3969_v54  ;;  %v917_v35 = vadd.f32 %v3999_v49, %v916_v45  ;;  %3290 = vmatprep.mubr.bf16.mxu1 %v978_v30 }
 0x2ee   : > { %v4052_v37 = vadd.f32 %v925_v32, %v3973_v57  ;;  %3291 = vmatmul.mubr.bf16.gmra.mrb[20].mxu1 %v979_v33  ;;  %v970_v23 = vmax.f32 %v4049_v36, 0.0 }
 0x2ef   : > { %v4055_v38 = vadd.f32 %v917_v35, %v3975_v59  ;;  %v968_v41 = vmax.f32 %v4045_v34, 0.0 }
 0x2f0   : > { %v971_v39 = vmax.f32 %v4052_v37, 0.0 }
 0x2f1   : > { %v969_v54 = vmax.f32 %v4055_v38, 0.0  ;;  %v3268_v44 = vpop.f32.mrb[28].mxu0 }
 0x2f2   : > { %v938_v46 = vadd.f32 %v3268_v44, %v3999_v49  ;;  %v929_v56 = vpop.f32.mrb[29].mxu0  ;;  %v981_v51 = vpack.c.bf16 %v971_v39, %v970_v23 }
 0x2f3   : > { %v930_v47 = vadd.f32 %v3999_v49, %v929_v56  ;;  %v3269_v57 = vpop.f32.mrb[30].mxu0  ;;  %v980_v48 = vpack.c.bf16 %v969_v54, %v968_v41 }
 0x2f4   : > { %v941_v50 = vadd.f32 %v3269_v57, %v3999_v49  ;;  %v932_v59 = vpop.f32.mrb[31].mxu0  ;;  %v4069_v55 = vadd.f32 %v938_v46, %v3983_v6  ;;  %v3644_v6 = vld [vmem:[#allocation4 + $0x70] sm:$0xff]  }
 0x2f5   : > { %v4065_v52 = vadd.f32 %v930_v47, %v3981_v4  ;;  %v933_v53 = vadd.f32 %v3999_v49, %v932_v59  ;;  %3294 = vmatprep.mubr.bf16.mxu1 %v980_v48  ;;  %3314 = vmatprep.subr.bf16.mxu0 %v3644_v6 }
 0x2f6   : > { %v4072_v58 = vadd.f32 %v941_v50, %v3985_v7  ;;  %3295 = vmatmul.mubr.bf16.gmra.mrb[24].mxu1 %v981_v51  ;;  %v974_v3 = vmax.f32 %v4069_v55, 0.0  ;;  %3315 = vmatpush3.bf16.msra.mxu0 %v3644_v6  ;;  %v3645_v7 = vld [vmem:[#allocation4 + $0x78] sm:$0xff]  }
 0x2f7   : > { %v4075_v60 = vadd.f32 %v933_v53, %v3987_v9  ;;  %v972_v2 = vmax.f32 %v4065_v52, 0.0  ;;  %3316 = vmatprep.subr.bf16.mxu0 %v3645_v7  ;;  %v3646_v9 = vld [vmem:[#allocation2 + $0x80] sm:$0xff]  }
 0x2f8   : > { %v975_v62 = vmax.f32 %v4072_v58, 0.0  ;;  %3334 = vmatprep.subr.bf16.mxu1 %v3646_v9 }
 0x2f9   : > { %v973_v4 = vmax.f32 %v4075_v60, 0.0  ;;  %3335 = vmatpush3.bf16.msra.mxu1 %v3646_v9 }
 0x2fa   : > { %v983_v5 = vpack.c.bf16 %v975_v62, %v974_v3  ;;  %3317 = vmatpush3.bf16.msra.mxu0 %v3645_v7  ;;  %3336 = vmatprep.subr.bf16.mxu1 %v3647_v8 }
 0x2fb   : > { %v982_v49 = vpack.c.bf16 %v973_v4, %v972_v2 }
 0x2fd   : > { %3298 = vmatprep.mubr.bf16.mxu1 %v982_v49  ;;  %3337 = vmatpush3.bf16.msra.mxu1 %v3647_v8 }
 0x2fe   : > { %3299 = vmatmul.mubr.bf16.gmra.mrb[28].mxu1 %v983_v5  ;;  %3338 = vmatprep.subr.bf16.mxu1 %v3648_v26 }
 0x301   : > { %3339 = vmatpush3.bf16.msra.mxu1 %v3648_v26 }
 0x302   : > { %3340 = vmatprep.subr.bf16.mxu1 %v3649_v10 }
 0x305   : > { %3341 = vmatpush3.bf16.msra.mxu1 %v3649_v10 }
 0x306   : > { %3342 = vmatprep.subr.bf16.mxu1 %v3650_v11 }
 0x309   : > { %3343 = vmatpush3.bf16.msra.mxu1 %v3650_v11 }
 0x3b9   : > { %v3288_v12 = vpop.f32.mrb[16].mxu1 }
 0x3ba   : > { %v1100_v29 = vadd.f32 %v3288_v12, %v2913_v28  ;;  %v1091_v13 = vpop.f32.mrb[17].mxu1 }
 0x3bb   : > { %v1092_v31 = vadd.f32 %v2913_v28, %v1091_v13  ;;  %v3289_v14 = vpop.f32.mrb[18].mxu1 }
 0x3bc   : > { %v1103_v16 = vadd.f32 %v3289_v14, %v2913_v28  ;;  %v1094_v20 = vpop.f32.mrb[19].mxu1  ;;  %v1156_v40 = vmax.f32 %v1100_v29, 0.0 }
 0x3bd   : > { %v1095_v21 = vadd.f32 %v2913_v28, %v1094_v20  ;;  %v1154_v24 = vmax.f32 %v1092_v31, 0.0 }
 0x3be   : > { %v1157_v22 = vmax.f32 %v1103_v16, 0.0 }
 0x3bf   : > { %v1155_v25 = vmax.f32 %v1095_v21, 0.0 }
 0x3c0   : > { %v1171_v42 = vpack.c.bf16 %v1157_v22, %v1156_v40  ;;  %v3651_v22 = vld [vmem:[#allocation2 + $0xa8] sm:$0xff]  }
 0x3c1   : > { %v1170_v27 = vpack.c.bf16 %v1155_v25, %v1154_v24  ;;  %v3292_v43 = vpop.f32.mrb[20].mxu1  ;;  %3344 = vmatprep.subr.bf16.mxu1 %v3651_v22  ;;  %v3652_v24 = vld [vmem:[#allocation2 + $0xb0] sm:$0xff]   ;;  %v3653_v25 = vld [vmem:[#allocation2 + $0xb8] sm:$0xff]  }
 0x3c2   : > { %v1116_v30 = vadd.f32 %v3292_v43, %v2913_v28  ;;  %v1107_v32 = vpop.f32.mrb[21].mxu1  ;;  %3345 = vmatpush3.bf16.msra.mxu1 %v3651_v22  ;;  %v3657_v43 = vld [vmem:[#allocation4 + $0x98] sm:$0xff]  }
 0x3c3   : > { %v1108_v45 = vadd.f32 %v2913_v28, %v1107_v32  ;;  %v3293_v33 = vpop.f32.mrb[22].mxu1  ;;  %3318 = vmatprep.mubr.bf16.mxu0 %v1170_v27  ;;  %3346 = vmatprep.subr.bf16.mxu1 %v3652_v24  ;;  %v3655_v27 = vld [vmem:[#allocation4 + $0x88] sm:$0xff]  }
 0x3c4   : > { %v1119_v35 = vadd.f32 %v3293_v33, %v2913_v28  ;;  %v1110_v39 = vpop.f32.mrb[23].mxu1  ;;  %3319 = vmatmul.mubr.bf16.vlgmr.msra.gmra.mrb[32].mxu0 %v1171_v42  ;;  %v1160_v54 = vmax.f32 %v1116_v30, 0.0  ;;  %v3654_v42 = vld [vmem:[#allocation4 + $0x80] sm:$0xff]   ;;  %v3659_v32 = vld [vmem:[#allocation4 + $0xa8] sm:$0xff]  }
 0x3c5   : > { %v1111_v41 = vadd.f32 %v2913_v28, %v1110_v39  ;;  %v1158_v23 = vmax.f32 %v1108_v45, 0.0  ;;  %3366 = vmatprep.subr.bf16.mxu0 %v3654_v42  ;;  %v3658_v30 = vld [vmem:[#allocation4 + $0xa0] sm:$0xff]  }
 0x3c6   : > { %v1161_v44 = vmax.f32 %v1119_v35, 0.0  ;;  %3347 = vmatpush3.bf16.msra.mxu1 %v3652_v24  ;;  %3367 = vmatpush3.bf16.msra.mxu0 %v3654_v42  ;;  %v4087_v45 = vld [vmem:[%s4483_s6 + $0x1] ss:$0 sm:$0xff] }
 0x3c7   : > { %v1159_v46 = vmax.f32 %v1111_v41, 0.0  ;;  %3348 = vmatprep.subr.bf16.mxu1 %v3653_v25  ;;  %3368 = vmatprep.subr.bf16.mxu0 %v3655_v27 }
 0x3c8   : > { %v1173_v56 = vpack.c.bf16 %v1161_v44, %v1160_v54 }
 0x3c9   : > { %v1172_v47 = vpack.c.bf16 %v1159_v46, %v1158_v23  ;;  %v3296_v57 = vpop.f32.mrb[24].mxu1 }
 0x3ca   : > { %v1132_v48 = vadd.f32 %v3296_v57, %v2913_v28  ;;  %v1123_v50 = vpop.f32.mrb[25].mxu1  ;;  %3349 = vmatpush3.bf16.msra.mxu1 %v3653_v25  ;;  %3369 = vmatpush3.bf16.msra.mxu0 %v3655_v27 }
 0x3cb   : > { %v1124_v59 = vadd.f32 %v2913_v28, %v1123_v50  ;;  %v3297_v51 = vpop.f32.mrb[26].mxu1  ;;  %3322 = vmatprep.mubr.bf16.mxu0 %v1172_v47 }
 0x3cc   : > { %v1135_v53 = vadd.f32 %v3297_v51, %v2913_v28  ;;  %v1126_v62 = vpop.f32.mrb[27].mxu1  ;;  %3323 = vmatmul.mubr.bf16.gmra.mrb[36].mxu0 %v1173_v56  ;;  %v1164_v4 = vmax.f32 %v1132_v48, 0.0 }
 0x3cd   : > { %v1127_v2 = vadd.f32 %v2913_v28, %v1126_v62  ;;  %v1162_v49 = vmax.f32 %v1124_v59, 0.0 }
 0x3ce   : > { %v1165_v3 = vmax.f32 %v1135_v53, 0.0 }
 0x3cf   : > { %v1163_v5 = vmax.f32 %v1127_v2, 0.0 }
 0x3d0   : > { %v1175_v6 = vpack.c.bf16 %v1165_v3, %v1164_v4 }
 0x3d1   : > { %v1174_v7 = vpack.c.bf16 %v1163_v5, %v1162_v49  ;;  %v3300_v9 = vpop.f32.mrb[28].mxu1 }
 0x3d2   : > { %v1148_v8 = vadd.f32 %v3300_v9, %v2913_v28  ;;  %v1139_v26 = vpop.f32.mrb[29].mxu1 }
 0x3d3   : > { %v1140_v10 = vadd.f32 %v2913_v28, %v1139_v26  ;;  %v3301_v11 = vpop.f32.mrb[30].mxu1  ;;  %3326 = vmatprep.mubr.bf16.mxu0 %v1174_v7 }
 0x3d4   : > { %v1151_v12 = vadd.f32 %v3301_v11, %v2913_v28  ;;  %v1142_v29 = vpop.f32.mrb[31].mxu1  ;;  %3327 = vmatmul.mubr.bf16.gmra.mrb[40].mxu0 %v1175_v6  ;;  %v1168_v31 = vmax.f32 %v1148_v8, 0.0 }
 0x3d5   : > { %v1143_v13 = vadd.f32 %v2913_v28, %v1142_v29  ;;  %v1166_v16 = vmax.f32 %v1140_v10, 0.0  ;;  %v3656_v28 = vld [vmem:[#allocation4 + $0x90] sm:$0xff]  }
 0x3d6   : > { %v1169_v14 = vmax.f32 %v1151_v12, 0.0  ;;  %3370 = vmatprep.subr.bf16.mxu0 %v3656_v28 }
 0x3d7   : > { %v1167_v20 = vmax.f32 %v1143_v13, 0.0  ;;  %3371 = vmatpush3.bf16.msra.mxu0 %v3656_v28 }
 0x3d8   : > { %v1177_v21 = vpack.c.bf16 %v1169_v14, %v1168_v31  ;;  %3372 = vmatprep.subr.bf16.mxu0 %v3657_v43 }
 0x3d9   : > { %v1176_v40 = vpack.c.bf16 %v1167_v20, %v1166_v16 }
 0x3db   : > { %3330 = vmatprep.mubr.bf16.mxu0 %v1176_v40  ;;  %3373 = vmatpush3.bf16.msra.mxu0 %v3657_v43 }
 0x3dc   : > { %3331 = vmatmul.mubr.bf16.gmra.mrb[44].mxu0 %v1177_v21  ;;  %3374 = vmatprep.subr.bf16.mxu0 %v3658_v30 }
 0x3df   : > { %3375 = vmatpush3.bf16.msra.mxu0 %v3658_v30 }
 0x3e0   : > { %3376 = vmatprep.subr.bf16.mxu0 %v3659_v32 }
 0x3e3   : > { %3377 = vmatpush3.bf16.msra.mxu0 %v3659_v32 }
 0x497   : > { %v3320_v33 = vpop.f32.mrb[32].mxu0 }
 0x498   : > { %v1294_v35 = vadd.f32 %v3320_v33, %v4087_v45  ;;  %v1285_v39 = vpop.f32.mrb[33].mxu0 }
 0x499   : > { %v1286_v41 = vadd.f32 %v4087_v45, %v1285_v39  ;;  %v3321_v54 = vpop.f32.mrb[34].mxu0 }
 0x49a   : > { %v1297_v44 = vadd.f32 %v3321_v54, %v4087_v45  ;;  %v1288_v23 = vpop.f32.mrb[35].mxu0  ;;  %v4097_v47 = vadd.f32 %v1294_v35, %v4009_v63 }
 0x49b   : > { %v4093_v46 = vadd.f32 %v1286_v41, %v4005_v61  ;;  %v1289_v56 = vadd.f32 %v4087_v45, %v1288_v23 }
 0x49c   : > { %v4100_v57 = vadd.f32 %v1297_v44, %v4012_v0  ;;  %v1366_v61 = vmax.f32 %v4097_v47, 0.0 }
 0x49d   : > { %v4103_v48 = vadd.f32 %v1289_v56, %v4015_v1  ;;  %v1364_v59 = vmax.f32 %v4093_v46, 0.0 }
 0x49e   : > { %v1367_v50 = vmax.f32 %v4100_v57, 0.0 }
 0x49f   : > { %v1365_v51 = vmax.f32 %v4103_v48, 0.0  ;;  %v3324_v53 = vpop.f32.mrb[36].mxu0 }
 0x4a0   : > { %v1310_v62 = vadd.f32 %v3324_v53, %v4087_v45  ;;  %v1301_v2 = vpop.f32.mrb[37].mxu0  ;;  %v1381_v3 = vpack.c.bf16 %v1367_v50, %v1366_v61  ;;  %v3663_v53 = vld [vmem:[#allocation2 + $0xc8] sm:$0xff]   ;;  %v3664_v61 = vld [vmem:[#allocation2 + $0xd0] sm:$0xff]  }
 0x4a1   : > { %v1302_v63 = vadd.f32 %v4087_v45, %v1301_v2  ;;  %v3325_v4 = vpop.f32.mrb[38].mxu0  ;;  %v1380_v0 = vpack.c.bf16 %v1365_v51, %v1364_v59  ;;  %v3666_v2 = vld [vmem:[#allocation2 + $0xe0] sm:$0xff]  }
 0x4a2   : > { %v1313_v1 = vadd.f32 %v3325_v4, %v4087_v45  ;;  %v1304_v49 = vpop.f32.mrb[39].mxu0  ;;  %v4117_v7 = vadd.f32 %v1310_v62, %v4029_v17  ;;  %v3665_v62 = vld [vmem:[#allocation2 + $0xd8] sm:$0xff]  }
 0x4a3   : > { %v4113_v5 = vadd.f32 %v1302_v63, %v4025_v15  ;;  %v1305_v6 = vadd.f32 %v4087_v45, %v1304_v49  ;;  %3350 = vmatprep.mubr.bf16.mxu1 %v1380_v0  ;;  %v2933_v63 = vld [vmem:[%s4481_s4 + $0x2] ss:$0 sm:$0xff] }
 0x4a4   : > { %v4120_v9 = vadd.f32 %v1313_v1, %v4032_v18  ;;  %3351 = vmatmul.mubr.bf16.vlgmr.msra.gmra.mrb[32].mxu1 %v1381_v3  ;;  %v1370_v12 = vmax.f32 %v4117_v7, 0.0 }
 0x4a5   : > { %v4123_v8 = vadd.f32 %v1305_v6, %v4035_v19  ;;  %v1368_v10 = vmax.f32 %v4113_v5, 0.0 }
 0x4a6   : > { %v1371_v26 = vmax.f32 %v4120_v9, 0.0 }
 0x4a7   : > { %v1369_v15 = vmax.f32 %v4123_v8, 0.0  ;;  %v3328_v11 = vpop.f32.mrb[40].mxu0 }
 0x4a8   : > { %v1326_v29 = vadd.f32 %v3328_v11, %v4087_v45  ;;  %v1317_v17 = vpop.f32.mrb[41].mxu0  ;;  %v1383_v16 = vpack.c.bf16 %v1371_v26, %v1370_v12 }
 0x4a9   : > { %v1318_v13 = vadd.f32 %v4087_v45, %v1317_v17  ;;  %v3329_v18 = vpop.f32.mrb[42].mxu0  ;;  %v1382_v31 = vpack.c.bf16 %v1369_v15, %v1368_v10 }
 0x4aa   : > { %v1329_v14 = vadd.f32 %v3329_v18, %v4087_v45  ;;  %v1320_v19 = vpop.f32.mrb[43].mxu0  ;;  %v4137_v40 = vadd.f32 %v1326_v29, %v4049_v36 }
 0x4ab   : > { %v4133_v20 = vadd.f32 %v1318_v13, %v4045_v34  ;;  %v1321_v21 = vadd.f32 %v4087_v45, %v1320_v19  ;;  %3354 = vmatprep.mubr.bf16.mxu1 %v1382_v31 }
 0x4ac   : > { %v4140_v22 = vadd.f32 %v1329_v14, %v4052_v37  ;;  %3355 = vmatmul.mubr.bf16.gmra.mrb[36].mxu1 %v1383_v16  ;;  %v1374_v28 = vmax.f32 %v4137_v40, 0.0 }
 0x4ad   : > { %v4143_v24 = vadd.f32 %v1321_v21, %v4055_v38  ;;  %v1372_v42 = vmax.f32 %v4133_v20, 0.0 }
 0x4ae   : > { %v1375_v25 = vmax.f32 %v4140_v22, 0.0 }
 0x4af   : > { %v1373_v34 = vmax.f32 %v4143_v24, 0.0  ;;  %v3332_v27 = vpop.f32.mrb[44].mxu0 }
 0x4b0   : > { %v1342_v43 = vadd.f32 %v3332_v27, %v4087_v45  ;;  %v1333_v36 = vpop.f32.mrb[45].mxu0  ;;  %v1385_v35 = vpack.c.bf16 %v1375_v25, %v1374_v28 }
 0x4b1   : > { %v1334_v30 = vadd.f32 %v4087_v45, %v1333_v36  ;;  %v3333_v37 = vpop.f32.mrb[46].mxu0  ;;  %v1384_v32 = vpack.c.bf16 %v1373_v34, %v1372_v42 }
 0x4b2   : > { %v1345_v33 = vadd.f32 %v3333_v37, %v4087_v45  ;;  %v1336_v38 = vpop.f32.mrb[47].mxu0  ;;  %v4157_v54 = vadd.f32 %v1342_v43, %v4069_v55  ;;  %v3660_v55 = vld [vmem:[#allocation4 + $0xb0] sm:$0xff]  }
 0x4b3   : > { %v4153_v39 = vadd.f32 %v1334_v30, %v4065_v52  ;;  %v1337_v41 = vadd.f32 %v4087_v45, %v1336_v38  ;;  %3358 = vmatprep.mubr.bf16.mxu1 %v1384_v32  ;;  %3378 = vmatprep.subr.bf16.mxu0 %v3660_v55 }
 0x4b4   : > { %v4160_v44 = vadd.f32 %v1345_v33, %v4072_v58  ;;  %3359 = vmatmul.mubr.bf16.gmra.mrb[40].mxu1 %v1385_v35  ;;  %v1378_v59 = vmax.f32 %v4157_v54, 0.0  ;;  %3379 = vmatpush3.bf16.msra.mxu0 %v3660_v55  ;;  %v3661_v58 = vld [vmem:[#allocation4 + $0xb8] sm:$0xff]  }
 0x4b5   : > { %v4163_v23 = vadd.f32 %v1337_v41, %v4075_v60  ;;  %v1376_v50 = vmax.f32 %v4153_v39, 0.0  ;;  %3380 = vmatprep.subr.bf16.mxu0 %v3661_v58  ;;  %v3662_v60 = vld [vmem:[#allocation2 + $0xc0] sm:$0xff]  }
 0x4b6   : > { %v1379_v56 = vmax.f32 %v4160_v44, 0.0  ;;  %3398 = vmatprep.subr.bf16.mxu1 %v3662_v60 }
 0x4b7   : > { %v1377_v52 = vmax.f32 %v4163_v23, 0.0  ;;  %3399 = vmatpush3.bf16.msra.mxu1 %v3662_v60 }
 0x4b8   : > { %v1387_v51 = vpack.c.bf16 %v1379_v56, %v1378_v59  ;;  %3381 = vmatpush3.bf16.msra.mxu0 %v3661_v58  ;;  %3400 = vmatprep.subr.bf16.mxu1 %v3663_v53 }
 0x4b9   : > { %v1386_v45 = vpack.c.bf16 %v1377_v52, %v1376_v50 }
 0x4bb   : > { %3362 = vmatprep.mubr.bf16.mxu1 %v1386_v45  ;;  %3401 = vmatpush3.bf16.msra.mxu1 %v3663_v53 }
 0x4bc   : > { %3363 = vmatmul.mubr.bf16.gmra.mrb[44].mxu1 %v1387_v51  ;;  %3402 = vmatprep.subr.bf16.mxu1 %v3664_v61 }
 0x4bf   : > { %3403 = vmatpush3.bf16.msra.mxu1 %v3664_v61 }
 0x4c0   : > { %3404 = vmatprep.subr.bf16.mxu1 %v3665_v62 }
 0x4c3   : > { %3405 = vmatpush3.bf16.msra.mxu1 %v3665_v62 }
 0x4c4   : > { %3406 = vmatprep.subr.bf16.mxu1 %v3666_v2 }
 0x4c7   : > { %3407 = vmatpush3.bf16.msra.mxu1 %v3666_v2 }
 0x577   : > { %v3352_v4 = vpop.f32.mrb[32].mxu1 }
 0x578   : > { %v1504_v0 = vadd.f32 %v3352_v4, %v2933_v63  ;;  %v1495_v3 = vpop.f32.mrb[33].mxu1 }
 0x579   : > { %v1496_v1 = vadd.f32 %v2933_v63, %v1495_v3  ;;  %v3353_v49 = vpop.f32.mrb[34].mxu1 }
 0x57a   : > { %v1507_v6 = vadd.f32 %v3353_v49, %v2933_v63  ;;  %v1498_v26 = vpop.f32.mrb[35].mxu1  ;;  %v1560_v15 = vmax.f32 %v1504_v0, 0.0 }
 0x57b   : > { %v1499_v10 = vadd.f32 %v2933_v63, %v1498_v26  ;;  %v1558_v12 = vmax.f32 %v1496_v1, 0.0 }
 0x57c   : > { %v1561_v11 = vmax.f32 %v1507_v6, 0.0 }
 0x57d   : > { %v1559_v29 = vmax.f32 %v1499_v10, 0.0 }
 0x57e   : > { %v1575_v17 = vpack.c.bf16 %v1561_v11, %v1560_v15  ;;  %v3667_v11 = vld [vmem:[#allocation2 + $0xe8] sm:$0xff]  }
 0x57f   : > { %v1574_v13 = vpack.c.bf16 %v1559_v29, %v1558_v12  ;;  %v3356_v18 = vpop.f32.mrb[36].mxu1  ;;  %3408 = vmatprep.subr.bf16.mxu1 %v3667_v11  ;;  %v3668_v12 = vld [vmem:[#allocation2 + $0xf0] sm:$0xff]   ;;  %v3669_v29 = vld [vmem:[#allocation2 + $0xf8] sm:$0xff]  }
 0x580   : > { %v1520_v31 = vadd.f32 %v3356_v18, %v2933_v63  ;;  %v1511_v14 = vpop.f32.mrb[37].mxu1  ;;  %3409 = vmatpush3.bf16.msra.mxu1 %v3667_v11  ;;  %v3673_v18 = vld [vmem:[#allocation4 + $0xd8] sm:$0xff]  }
 0x581   : > { %v1512_v19 = vadd.f32 %v2933_v63, %v1511_v14  ;;  %v3357_v16 = vpop.f32.mrb[38].mxu1  ;;  %3382 = vmatprep.mubr.bf16.mxu0 %v1574_v13  ;;  %3410 = vmatprep.subr.bf16.mxu1 %v3668_v12  ;;  %v3671_v13 = vld [vmem:[#allocation4 + $0xc8] sm:$0xff]  }
 0x582   : > { %v1523_v21 = vadd.f32 %v3357_v16, %v2933_v63  ;;  %v1514_v25 = vpop.f32.mrb[39].mxu1  ;;  %3383 = vmatmul.mubr.bf16.vlgmr.msra.gmra.mrb[48].mxu0 %v1575_v17  ;;  %v1564_v34 = vmax.f32 %v1520_v31, 0.0  ;;  %v3670_v17 = vld [vmem:[#allocation4 + $0xc0] sm:$0xff]   ;;  %v3675_v14 = vld [vmem:[#allocation4 + $0xe8] sm:$0xff]  }
 0x583   : > { %v1515_v42 = vadd.f32 %v2933_v63, %v1514_v25  ;;  %v1562_v28 = vmax.f32 %v1512_v19, 0.0  ;;  %3430 = vmatprep.subr.bf16.mxu0 %v3670_v17  ;;  %v3674_v31 = vld [vmem:[#allocation4 + $0xe0] sm:$0xff]  }
 0x584   : > { %v1565_v27 = vmax.f32 %v1523_v21, 0.0  ;;  %3411 = vmatpush3.bf16.msra.mxu1 %v3668_v12  ;;  %3431 = vmatpush3.bf16.msra.mxu0 %v3670_v17  ;;  %v4175_v19 = vld [vmem:[%s4483_s6 + $0x2] ss:$0 sm:$0xff] }
 0x585   : > { %v1563_v43 = vmax.f32 %v1515_v42, 0.0  ;;  %3412 = vmatprep.subr.bf16.mxu1 %v3669_v29  ;;  %3432 = vmatprep.subr.bf16.mxu0 %v3671_v13 }
 0x586   : > { %v1577_v36 = vpack.c.bf16 %v1565_v27, %v1564_v34 }
 0x587   : > { %v1576_v30 = vpack.c.bf16 %v1563_v43, %v1562_v28  ;;  %v3360_v37 = vpop.f32.mrb[40].mxu1 }
 0x588   : > { %v1536_v32 = vadd.f32 %v3360_v37, %v2933_v63  ;;  %v1527_v33 = vpop.f32.mrb[41].mxu1  ;;  %3413 = vmatpush3.bf16.msra.mxu1 %v3669_v29  ;;  %3433 = vmatpush3.bf16.msra.mxu0 %v3671_v13 }
 0x589   : > { %v1528_v38 = vadd.f32 %v2933_v63, %v1527_v33  ;;  %v3361_v35 = vpop.f32.mrb[42].mxu1  ;;  %3386 = vmatprep.mubr.bf16.mxu0 %v1576_v30 }
 0x58a   : > { %v1539_v41 = vadd.f32 %v3361_v35, %v2933_v63  ;;  %v1530_v56 = vpop.f32.mrb[43].mxu1  ;;  %3387 = vmatmul.mubr.bf16.gmra.mrb[52].mxu0 %v1577_v36  ;;  %v1568_v52 = vmax.f32 %v1536_v32, 0.0 }
 0x58b   : > { %v1531_v50 = vadd.f32 %v2933_v63, %v1530_v56  ;;  %v1566_v45 = vmax.f32 %v1528_v38, 0.0 }
 0x58c   : > { %v1569_v59 = vmax.f32 %v1539_v41, 0.0 }
 0x58d   : > { %v1567_v51 = vmax.f32 %v1531_v50, 0.0 }
 0x58e   : > { %v1579_v55 = vpack.c.bf16 %v1569_v59, %v1568_v52 }
 0x58f   : > { %v1578_v58 = vpack.c.bf16 %v1567_v51, %v1566_v45  ;;  %v3364_v60 = vpop.f32.mrb[44].mxu1 }
 0x590   : > { %v1552_v53 = vadd.f32 %v3364_v60, %v2933_v63  ;;  %v1543_v61 = vpop.f32.mrb[45].mxu1 }
 0x591   : > { %v1544_v62 = vadd.f32 %v2933_v63, %v1543_v61  ;;  %v3365_v2 = vpop.f32.mrb[46].mxu1  ;;  %3390 = vmatprep.mubr.bf16.mxu0 %v1578_v58 }
 0x592   : > { %v1555_v4 = vadd.f32 %v3365_v2, %v2933_v63  ;;  %v1546_v0 = vpop.f32.mrb[47].mxu1  ;;  %3391 = vmatmul.mubr.bf16.gmra.mrb[56].mxu0 %v1579_v55  ;;  %v1572_v1 = vmax.f32 %v1552_v53, 0.0 }
 0x593   : > { %v1547_v3 = vadd.f32 %v2933_v63, %v1546_v0  ;;  %v1570_v6 = vmax.f32 %v1544_v62, 0.0  ;;  %v3672_v63 = vld [vmem:[#allocation4 + $0xd0] sm:$0xff]  }
 0x594   : > { %v1573_v49 = vmax.f32 %v1555_v4, 0.0  ;;  %3434 = vmatprep.subr.bf16.mxu0 %v3672_v63 }
 0x595   : > { %v1571_v26 = vmax.f32 %v1547_v3, 0.0  ;;  %3435 = vmatpush3.bf16.msra.mxu0 %v3672_v63 }
 0x596   : > { %v1581_v10 = vpack.c.bf16 %v1573_v49, %v1572_v1  ;;  %3436 = vmatprep.subr.bf16.mxu0 %v3673_v18 }
 0x597   : > { %v1580_v15 = vpack.c.bf16 %v1571_v26, %v1570_v6 }
 0x599   : > { %3394 = vmatprep.mubr.bf16.mxu0 %v1580_v15  ;;  %3437 = vmatpush3.bf16.msra.mxu0 %v3673_v18 }
 0x59a   : > { %3395 = vmatmul.mubr.bf16.gmra.mrb[60].mxu0 %v1581_v10  ;;  %3438 = vmatprep.subr.bf16.mxu0 %v3674_v31 }
 0x59d   : > { %3439 = vmatpush3.bf16.msra.mxu0 %v3674_v31 }
 0x59e   : > { %3440 = vmatprep.subr.bf16.mxu0 %v3675_v14 }
 0x5a1   : > { %3441 = vmatpush3.bf16.msra.mxu0 %v3675_v14 }
 0x655   : > { %v3384_v16 = vpop.f32.mrb[48].mxu0 }
 0x656   : > { %v1698_v21 = vadd.f32 %v3384_v16, %v4175_v19  ;;  %v1689_v25 = vpop.f32.mrb[49].mxu0 }
 0x657   : > { %v1690_v42 = vadd.f32 %v4175_v19, %v1689_v25  ;;  %v3385_v34 = vpop.f32.mrb[50].mxu0 }
 0x658   : > { %v1701_v27 = vadd.f32 %v3385_v34, %v4175_v19  ;;  %v1692_v28 = vpop.f32.mrb[51].mxu0  ;;  %v4185_v30 = vadd.f32 %v1698_v21, %v4097_v47 }
 0x659   : > { %v4181_v43 = vadd.f32 %v1690_v42, %v4093_v46  ;;  %v1693_v36 = vadd.f32 %v4175_v19, %v1692_v28 }
 0x65a   : > { %v4188_v37 = vadd.f32 %v1701_v27, %v4100_v57  ;;  %v1770_v46 = vmax.f32 %v4185_v30, 0.0 }
 0x65b   : > { %v4191_v32 = vadd.f32 %v1693_v36, %v4103_v48  ;;  %v1768_v38 = vmax.f32 %v4181_v43, 0.0 }
 0x65c   : > { %v1771_v33 = vmax.f32 %v4188_v37, 0.0 }
 0x65d   : > { %v1769_v35 = vmax.f32 %v4191_v32, 0.0  ;;  %v3388_v41 = vpop.f32.mrb[52].mxu0 }
 0x65e   : > { %v1714_v56 = vadd.f32 %v3388_v41, %v4175_v19  ;;  %v1705_v50 = vpop.f32.mrb[53].mxu0  ;;  %v1785_v59 = vpack.c.bf16 %v1771_v33, %v1770_v46  ;;  %v3679_v41 = vld [vmem:[#allocation2 + $0x108] sm:$0xff]   ;;  %v3680_v46 = vld [vmem:[#allocation2 + $0x110] sm:$0xff]  }
 0x65f   : > { %v1706_v47 = vadd.f32 %v4175_v19, %v1705_v50  ;;  %v3389_v52 = vpop.f32.mrb[54].mxu0  ;;  %v1784_v57 = vpack.c.bf16 %v1769_v35, %v1768_v38  ;;  %v3682_v50 = vld [vmem:[#allocation2 + $0x120] sm:$0xff]  }
 0x660   : > { %v1717_v48 = vadd.f32 %v3389_v52, %v4175_v19  ;;  %v1708_v45 = vpop.f32.mrb[55].mxu0  ;;  %v4205_v58 = vadd.f32 %v1714_v56, %v4117_v7  ;;  %v3681_v56 = vld [vmem:[#allocation2 + $0x118] sm:$0xff]  }
 0x661   : > { %v4201_v51 = vadd.f32 %v1706_v47, %v4113_v5  ;;  %v1709_v55 = vadd.f32 %v4175_v19, %v1708_v45  ;;  %3414 = vmatprep.mubr.bf16.mxu1 %v1784_v57  ;;  %v2953_v47 = vld [vmem:[%s4481_s4 + $0x3] ss:$0 sm:$0xff] }
 0x662   : > { %v4208_v60 = vadd.f32 %v1717_v48, %v4120_v9  ;;  %3415 = vmatmul.mubr.bf16.vlgmr.msra.gmra.mrb[48].mxu1 %v1785_v59  ;;  %v1774_v4 = vmax.f32 %v4205_v58, 0.0 }
 0x663   : > { %v4211_v53 = vadd.f32 %v1709_v55, %v4123_v8  ;;  %v1772_v62 = vmax.f32 %v4201_v51, 0.0 }
 0x664   : > { %v1775_v61 = vmax.f32 %v4208_v60, 0.0 }
 0x665   : > { %v1773_v5 = vmax.f32 %v4211_v53, 0.0  ;;  %v3392_v2 = vpop.f32.mrb[56].mxu0 }
 0x666   : > { %v1730_v0 = vadd.f32 %v3392_v2, %v4175_v19  ;;  %v1721_v7 = vpop.f32.mrb[57].mxu0  ;;  %v1787_v6 = vpack.c.bf16 %v1775_v61, %v1774_v4 }
 0x667   : > { %v1722_v3 = vadd.f32 %v4175_v19, %v1721_v7  ;;  %v3393_v9 = vpop.f32.mrb[58].mxu0  ;;  %v1786_v1 = vpack.c.bf16 %v1773_v5, %v1772_v62 }
 0x668   : > { %v1733_v49 = vadd.f32 %v3393_v9, %v4175_v19  ;;  %v1724_v8 = vpop.f32.mrb[59].mxu0  ;;  %v4225_v15 = vadd.f32 %v1730_v0, %v4137_v40 }
 0x669   : > { %v4221_v26 = vadd.f32 %v1722_v3, %v4133_v20  ;;  %v1725_v10 = vadd.f32 %v4175_v19, %v1724_v8  ;;  %3418 = vmatprep.mubr.bf16.mxu1 %v1786_v1 }
 0x66a   : > { %v4228_v11 = vadd.f32 %v1733_v49, %v4140_v22  ;;  %3419 = vmatmul.mubr.bf16.gmra.mrb[52].mxu1 %v1787_v6  ;;  %v1778_v63 = vmax.f32 %v4225_v15, 0.0 }
 0x66b   : > { %v4231_v12 = vadd.f32 %v1725_v10, %v4143_v24  ;;  %v1776_v17 = vmax.f32 %v4221_v26, 0.0 }
 0x66c   : > { %v1779_v29 = vmax.f32 %v4228_v11, 0.0 }
 0x66d   : > { %v1777_v20 = vmax.f32 %v4231_v12, 0.0  ;;  %v3396_v13 = vpop.f32.mrb[60].mxu0 }
 0x66e   : > { %v1746_v18 = vadd.f32 %v3396_v13, %v4175_v19  ;;  %v1737_v40 = vpop.f32.mrb[61].mxu0  ;;  %v1789_v21 = vpack.c.bf16 %v1779_v29, %v1778_v63 }
 0x66f   : > { %v1738_v31 = vadd.f32 %v4175_v19, %v1737_v40  ;;  %v3397_v22 = vpop.f32.mrb[62].mxu0  ;;  %v1788_v14 = vpack.c.bf16 %v1777_v20, %v1776_v17 }
 0x670   : > { %v1749_v16 = vadd.f32 %v3397_v22, %v4175_v19  ;;  %v1740_v24 = vpop.f32.mrb[63].mxu0  ;;  %v4245_v34 = vadd.f32 %v1746_v18, %v4157_v54  ;;  %v3676_v54 = vld [vmem:[#allocation4 + $0xf0] sm:$0xff]  }
 0x671   : > { %v4241_v25 = vadd.f32 %v1738_v31, %v4153_v39  ;;  %v1741_v42 = vadd.f32 %v4175_v19, %v1740_v24  ;;  %3422 = vmatprep.mubr.bf16.mxu1 %v1788_v14  ;;  %3442 = vmatprep.subr.bf16.mxu0 %v3676_v54 }
 0x672   : > { %v4248_v27 = vadd.f32 %v1749_v16, %v4160_v44  ;;  %3423 = vmatmul.mubr.bf16.gmra.mrb[56].mxu1 %v1789_v21  ;;  %v1782_v38 = vmax.f32 %v4245_v34, 0.0  ;;  %3443 = vmatpush3.bf16.msra.mxu0 %v3676_v54  ;;  %v3677_v44 = vld [vmem:[#allocation4 + $0xf8] sm:$0xff]  }
 0x673   : > { %v4251_v28 = vadd.f32 %v1741_v42, %v4163_v23  ;;  %v1780_v33 = vmax.f32 %v4241_v25, 0.0  ;;  %3444 = vmatprep.subr.bf16.mxu0 %v3677_v44  ;;  %v3678_v23 = vld [vmem:[#allocation2 + $0x100] sm:$0xff]  }
 0x674   : > { %v1783_v36 = vmax.f32 %v4248_v27, 0.0  ;;  %3462 = vmatprep.subr.bf16.mxu1 %v3678_v23 }
 0x675   : > { %v1781_v39 = vmax.f32 %v4251_v28, 0.0  ;;  %3463 = vmatpush3.bf16.msra.mxu1 %v3678_v23 }
 0x676   : > { %v1791_v35 = vpack.c.bf16 %v1783_v36, %v1782_v38  ;;  %3445 = vmatpush3.bf16.msra.mxu0 %v3677_v44  ;;  %3464 = vmatprep.subr.bf16.mxu1 %v3679_v41 }
 0x677   : > { %v1790_v19 = vpack.c.bf16 %v1781_v39, %v1780_v33 }
 0x679   : > { %3426 = vmatprep.mubr.bf16.mxu1 %v1790_v19  ;;  %3465 = vmatpush3.bf16.msra.mxu1 %v3679_v41 }
 0x67a   : > { %3427 = vmatmul.mubr.bf16.gmra.mrb[60].mxu1 %v1791_v35  ;;  %3466 = vmatprep.subr.bf16.mxu1 %v3680_v46 }
 0x67d   : > { %3467 = vmatpush3.bf16.msra.mxu1 %v3680_v46 }
 0x67e   : > { %3468 = vmatprep.subr.bf16.mxu1 %v3681_v56 }
 0x681   : > { %3469 = vmatpush3.bf16.msra.mxu1 %v3681_v56 }
 0x682   : > { %3470 = vmatprep.subr.bf16.mxu1 %v3682_v50 }
 0x685   : > { %3471 = vmatpush3.bf16.msra.mxu1 %v3682_v50 }
 0x735   : > { %v3416_v52 = vpop.f32.mrb[48].mxu1 }
 0x736   : > { %v1908_v57 = vadd.f32 %v3416_v52, %v2953_v47  ;;  %v1899_v59 = vpop.f32.mrb[49].mxu1 }
 0x737   : > { %v1900_v48 = vadd.f32 %v2953_v47, %v1899_v59  ;;  %v3417_v45 = vpop.f32.mrb[50].mxu1 }
 0x738   : > { %v1911_v55 = vadd.f32 %v3417_v45, %v2953_v47  ;;  %v1902_v61 = vpop.f32.mrb[51].mxu1  ;;  %v1964_v5 = vmax.f32 %v1908_v57, 0.0 }
 0x739   : > { %v1903_v62 = vadd.f32 %v2953_v47, %v1902_v61  ;;  %v1962_v4 = vmax.f32 %v1900_v48, 0.0 }
 0x73a   : > { %v1965_v2 = vmax.f32 %v1911_v55, 0.0 }
 0x73b   : > { %v1963_v0 = vmax.f32 %v1903_v62, 0.0 }
 0x73c   : > { %v1979_v7 = vpack.c.bf16 %v1965_v2, %v1964_v5  ;;  %v3683_v2 = vld [vmem:[#allocation2 + $0x128] sm:$0xff]  }
 0x73d   : > { %v1978_v3 = vpack.c.bf16 %v1963_v0, %v1962_v4  ;;  %v3420_v9 = vpop.f32.mrb[52].mxu1  ;;  %3472 = vmatprep.subr.bf16.mxu1 %v3683_v2  ;;  %v3684_v4 = vld [vmem:[#allocation2 + $0x130] sm:$0xff]   ;;  %v3685_v0 = vld [vmem:[#allocation2 + $0x138] sm:$0xff]  }
 0x73e   : > { %v1924_v1 = vadd.f32 %v3420_v9, %v2953_v47  ;;  %v1915_v49 = vpop.f32.mrb[53].mxu1  ;;  %3473 = vmatpush3.bf16.msra.mxu1 %v3683_v2  ;;  %v3689_v9 = vld [vmem:[#allocation4 + $0x118] sm:$0xff]  }
 0x73f   : > { %v1916_v8 = vadd.f32 %v2953_v47, %v1915_v49  ;;  %v3421_v6 = vpop.f32.mrb[54].mxu1  ;;  %3446 = vmatprep.mubr.bf16.mxu0 %v1978_v3  ;;  %3474 = vmatprep.subr.bf16.mxu1 %v3684_v4  ;;  %v3687_v3 = vld [vmem:[#allocation4 + $0x108] sm:$0xff]  }
 0x740   : > { %v1927_v10 = vadd.f32 %v3421_v6, %v2953_v47  ;;  %v1918_v29 = vpop.f32.mrb[55].mxu1  ;;  %3447 = vmatmul.mubr.bf16.vlgmr.msra.gmra.mrb[64].mxu0 %v1979_v7  ;;  %v1968_v20 = vmax.f32 %v1924_v1, 0.0  ;;  %v3686_v7 = vld [vmem:[#allocation4 + $0x100] sm:$0xff]   ;;  %v3691_v49 = vld [vmem:[#allocation4 + $0x128] sm:$0xff]  }
 0x741   : > { %v1919_v17 = vadd.f32 %v2953_v47, %v1918_v29  ;;  %v1966_v63 = vmax.f32 %v1916_v8, 0.0  ;;  %3494 = vmatprep.subr.bf16.mxu0 %v3686_v7  ;;  %v3690_v1 = vld [vmem:[#allocation4 + $0x120] sm:$0xff]  }
 0x742   : > { %v1969_v13 = vmax.f32 %v1927_v10, 0.0  ;;  %3475 = vmatpush3.bf16.msra.mxu1 %v3684_v4  ;;  %3495 = vmatpush3.bf16.msra.mxu0 %v3686_v7  ;;  %v4263_v8 = vld [vmem:[%s4483_s6 + $0x3] ss:$0 sm:$0xff] }
 0x743   : > { %v1967_v18 = vmax.f32 %v1919_v17, 0.0  ;;  %3476 = vmatprep.subr.bf16.mxu1 %v3685_v0  ;;  %3496 = vmatprep.subr.bf16.mxu0 %v3687_v3 }
 0x744   : > { %v1981_v40 = vpack.c.bf16 %v1969_v13, %v1968_v20 }
 0x745   : > { %v1980_v31 = vpack.c.bf16 %v1967_v18, %v1966_v63  ;;  %v3424_v22 = vpop.f32.mrb[56].mxu1 }
 0x746   : > { %v1940_v14 = vadd.f32 %v3424_v22, %v2953_v47  ;;  %v1931_v16 = vpop.f32.mrb[57].mxu1  ;;  %3477 = vmatpush3.bf16.msra.mxu1 %v3685_v0  ;;  %3497 = vmatpush3.bf16.msra.mxu0 %v3687_v3 }
 0x747   : > { %v1932_v24 = vadd.f32 %v2953_v47, %v1931_v16  ;;  %v3425_v21 = vpop.f32.mrb[58].mxu1  ;;  %3450 = vmatprep.mubr.bf16.mxu0 %v1980_v31 }
 0x748   : > { %v1943_v42 = vadd.f32 %v3425_v21, %v2953_v47  ;;  %v1934_v36 = vpop.f32.mrb[59].mxu1  ;;  %3451 = vmatmul.mubr.bf16.gmra.mrb[68].mxu0 %v1981_v40  ;;  %v1972_v39 = vmax.f32 %v1940_v14, 0.0 }
 0x749   : > { %v1935_v33 = vadd.f32 %v2953_v47, %v1934_v36  ;;  %v1970_v19 = vmax.f32 %v1932_v24, 0.0 }
 0x74a   : > { %v1973_v38 = vmax.f32 %v1943_v42, 0.0 }
 0x74b   : > { %v1971_v35 = vmax.f32 %v1935_v33, 0.0 }
 0x74c   : > { %v1983_v54 = vpack.c.bf16 %v1973_v38, %v1972_v39 }
 0x74d   : > { %v1982_v44 = vpack.c.bf16 %v1971_v35, %v1970_v19  ;;  %v3428_v23 = vpop.f32.mrb[60].mxu1 }
 0x74e   : > { %v1956_v41 = vadd.f32 %v3428_v23, %v2953_v47  ;;  %v1947_v46 = vpop.f32.mrb[61].mxu1 }
 0x74f   : > { %v1948_v56 = vadd.f32 %v2953_v47, %v1947_v46  ;;  %v3429_v50 = vpop.f32.mrb[62].mxu1  ;;  %3454 = vmatprep.mubr.bf16.mxu0 %v1982_v44 }
 0x750   : > { %v1959_v52 = vadd.f32 %v3429_v50, %v2953_v47  ;;  %v1950_v57 = vpop.f32.mrb[63].mxu1  ;;  %3455 = vmatmul.mubr.bf16.gmra.mrb[72].mxu0 %v1983_v54  ;;  %v1976_v48 = vmax.f32 %v1956_v41, 0.0 }
 0x751   : > { %v1951_v59 = vadd.f32 %v2953_v47, %v1950_v57  ;;  %v1974_v55 = vmax.f32 %v1948_v56, 0.0  ;;  %v3688_v47 = vld [vmem:[#allocation4 + $0x110] sm:$0xff]  }
 0x752   : > { %v1977_v45 = vmax.f32 %v1959_v52, 0.0  ;;  %3498 = vmatprep.subr.bf16.mxu0 %v3688_v47 }
 0x753   : > { %v1975_v61 = vmax.f32 %v1951_v59, 0.0  ;;  %3499 = vmatpush3.bf16.msra.mxu0 %v3688_v47 }
 0x754   : > { %v1985_v62 = vpack.c.bf16 %v1977_v45, %v1976_v48  ;;  %3500 = vmatprep.subr.bf16.mxu0 %v3689_v9 }
 0x755   : > { %v1984_v5 = vpack.c.bf16 %v1975_v61, %v1974_v55 }
 0x757   : > { %3458 = vmatprep.mubr.bf16.mxu0 %v1984_v5  ;;  %3501 = vmatpush3.bf16.msra.mxu0 %v3689_v9 }
 0x758   : > { %3459 = vmatmul.mubr.bf16.gmra.mrb[76].mxu0 %v1985_v62  ;;  %3502 = vmatprep.subr.bf16.mxu0 %v3690_v1 }
 0x75b   : > { %3503 = vmatpush3.bf16.msra.mxu0 %v3690_v1 }
 0x75c   : > { %3504 = vmatprep.subr.bf16.mxu0 %v3691_v49 }
 0x75f   : > { %3505 = vmatpush3.bf16.msra.mxu0 %v3691_v49 }
 0x813   : > { %v3448_v6 = vpop.f32.mrb[64].mxu0 }
 0x814   : > { %v2102_v10 = vadd.f32 %v3448_v6, %v4263_v8  ;;  %v2093_v29 = vpop.f32.mrb[65].mxu0 }
 0x815   : > { %v2094_v17 = vadd.f32 %v4263_v8, %v2093_v29  ;;  %v3449_v20 = vpop.f32.mrb[66].mxu0 }
 0x816   : > { %v2105_v13 = vadd.f32 %v3449_v20, %v4263_v8  ;;  %v2096_v63 = vpop.f32.mrb[67].mxu0  ;;  %v4273_v31 = vadd.f32 %v2102_v10, %v4185_v30 }
 0x817   : > { %v4269_v18 = vadd.f32 %v2094_v17, %v4181_v43  ;;  %v2097_v40 = vadd.f32 %v4263_v8, %v2096_v63 }
 0x818   : > { %v4276_v22 = vadd.f32 %v2105_v13, %v4188_v37  ;;  %v2174_v43 = vmax.f32 %v4273_v31, 0.0 }
 0x819   : > { %v4279_v14 = vadd.f32 %v2097_v40, %v4191_v32  ;;  %v2172_v24 = vmax.f32 %v4269_v18, 0.0 }
 0x81a   : > { %v2175_v16 = vmax.f32 %v4276_v22, 0.0 }
 0x81b   : > { %v2173_v21 = vmax.f32 %v4279_v14, 0.0  ;;  %v3452_v42 = vpop.f32.mrb[68].mxu0 }
 0x81c   : > { %v2118_v36 = vadd.f32 %v3452_v42, %v4263_v8  ;;  %v2109_v33 = vpop.f32.mrb[69].mxu0  ;;  %v2189_v38 = vpack.c.bf16 %v2175_v16, %v2174_v43  ;;  %v3695_v42 = vld [vmem:[%s4484_s7 + $0x8] sm:$0xff]   ;;  %v3696_v43 = vld [vmem:[%s4484_s7 + $0x10] sm:$0xff]  }
 0x81d   : > { %v2110_v30 = vadd.f32 %v4263_v8, %v2109_v33  ;;  %v3453_v39 = vpop.f32.mrb[70].mxu0  ;;  %v2188_v37 = vpack.c.bf16 %v2173_v21, %v2172_v24  ;;  %v4360_v33 = vld [vmem:[%s4484_s7 + $0x20] sm:$0xff]  }
 0x81e   : > { %v2121_v32 = vadd.f32 %v3453_v39, %v4263_v8  ;;  %v2112_v19 = vpop.f32.mrb[71].mxu0  ;;  %v4293_v44 = vadd.f32 %v2118_v36, %v4205_v58  ;;  %v3697_v36 = vld [vmem:[%s4484_s7 + $0x18] sm:$0xff]  }
 0x81f   : > { %v4289_v35 = vadd.f32 %v2110_v30, %v4201_v51  ;;  %v2113_v54 = vadd.f32 %v4263_v8, %v2112_v19  ;;  %3478 = vmatprep.mubr.bf16.mxu1 %v2188_v37  ;;  %v4367_v30 = vld [vmem:[%s4481_s4 + $0x4] ss:$0 sm:$0xff] }
 0x820   : > { %v4296_v23 = vadd.f32 %v2121_v32, %v4208_v60  ;;  %3479 = vmatmul.mubr.bf16.vlgmr.msra.gmra.mrb[64].mxu1 %v2189_v38  ;;  %v2178_v52 = vmax.f32 %v4293_v44, 0.0 }
 0x821   : > { %v4299_v41 = vadd.f32 %v2113_v54, %v4211_v53  ;;  %v2176_v56 = vmax.f32 %v4289_v35, 0.0 }
 0x822   : > { %v2179_v46 = vmax.f32 %v4296_v23, 0.0 }
 0x823   : > { %v2177_v51 = vmax.f32 %v4299_v41, 0.0  ;;  %v3456_v50 = vpop.f32.mrb[72].mxu0 }
 0x824   : > { %v2134_v57 = vadd.f32 %v3456_v50, %v4263_v8  ;;  %v2125_v58 = vpop.f32.mrb[73].mxu0  ;;  %v2191_v55 = vpack.c.bf16 %v2179_v46, %v2178_v52 }
 0x825   : > { %v2126_v59 = vadd.f32 %v4263_v8, %v2125_v58  ;;  %v3457_v60 = vpop.f32.mrb[74].mxu0  ;;  %v2190_v48 = vpack.c.bf16 %v2177_v51, %v2176_v56 }
 0x826   : > { %v2137_v45 = vadd.f32 %v3457_v60, %v4263_v8  ;;  %v2128_v53 = vpop.f32.mrb[75].mxu0  ;;  %v4313_v5 = vadd.f32 %v2134_v57, %v4225_v15 }
 0x827   : > { %v4309_v61 = vadd.f32 %v2126_v59, %v4221_v26  ;;  %v2129_v62 = vadd.f32 %v4263_v8, %v2128_v53  ;;  %3482 = vmatprep.mubr.bf16.mxu1 %v2190_v48 }
 0x828   : > { %v4316_v2 = vadd.f32 %v2137_v45, %v4228_v11  ;;  %3483 = vmatmul.mubr.bf16.gmra.mrb[68].mxu1 %v2191_v55  ;;  %v2182_v47 = vmax.f32 %v4313_v5, 0.0 }
 0x829   : > { %v4319_v4 = vadd.f32 %v2129_v62, %v4231_v12  ;;  %v2180_v7 = vmax.f32 %v4309_v61, 0.0 }
 0x82a   : > { %v2183_v0 = vmax.f32 %v4316_v2, 0.0 }
 0x82b   : > { %v2181_v26 = vmax.f32 %v4319_v4, 0.0  ;;  %v3460_v3 = vpop.f32.mrb[76].mxu0 }
 0x82c   : > { %v2150_v9 = vadd.f32 %v3460_v3, %v4263_v8  ;;  %v2141_v15 = vpop.f32.mrb[77].mxu0  ;;  %v2193_v10 = vpack.c.bf16 %v2183_v0, %v2182_v47 }
 0x82d   : > { %v2142_v1 = vadd.f32 %v4263_v8, %v2141_v15  ;;  %v3461_v11 = vpop.f32.mrb[78].mxu0  ;;  %v2192_v49 = vpack.c.bf16 %v2181_v26, %v2180_v7 }
 0x82e   : > { %v2153_v6 = vadd.f32 %v3461_v11, %v4263_v8  ;;  %v2144_v12 = vpop.f32.mrb[79].mxu0  ;;  %v4333_v20 = vadd.f32 %v2150_v9, %v4245_v34  ;;  %v3692_v34 = vld [vmem:[#allocation4 + $0x130] sm:$0xff]  }
 0x82f   : > { %v4329_v29 = vadd.f32 %v2142_v1, %v4241_v25  ;;  %v2145_v17 = vadd.f32 %v4263_v8, %v2144_v12  ;;  %3486 = vmatprep.mubr.bf16.mxu1 %v2192_v49  ;;  %3506 = vmatprep.subr.bf16.mxu0 %v3692_v34 }
 0x830   : > { %v4336_v13 = vadd.f32 %v2153_v6, %v4248_v27  ;;  %3487 = vmatmul.mubr.bf16.gmra.mrb[72].mxu1 %v2193_v10  ;;  %v2186_v24 = vmax.f32 %v4333_v20, 0.0  ;;  %3507 = vmatpush3.bf16.msra.mxu0 %v3692_v34  ;;  %v3693_v27 = vld [vmem:[#allocation4 + $0x138] sm:$0xff]  }
 0x831   : > { %v4339_v63 = vadd.f32 %v2145_v17, %v4251_v28  ;;  %v2184_v16 = vmax.f32 %v4329_v29, 0.0  ;;  %3508 = vmatprep.subr.bf16.mxu0 %v3693_v27  ;;  %v3694_v28 = vld [vmem:[%s4484_s7] sm:$0xff]  }
 0x832   : > { %v2187_v40 = vmax.f32 %v4336_v13, 0.0  ;;  %3558 = vmatprep.subr.bf16.mxu1 %v3694_v28 }
 0x833   : > { %v2185_v25 = vmax.f32 %v4339_v63, 0.0  ;;  %3566 = vmatpush3.bf16.msra.mxu1 %v3694_v28 }
 0x834   : > { %v2195_v21 = vpack.c.bf16 %v2187_v40, %v2186_v24  ;;  %3509 = vmatpush3.bf16.msra.mxu0 %v3693_v27  ;;  %3559 = vmatprep.subr.bf16.mxu1 %v3695_v42 }
 0x835   : > { %v2194_v8 = vpack.c.bf16 %v2185_v25, %v2184_v16  ;;  %3526 = vmatprep.subr.bf16.mxu0 %v3694_v28 }
 0x837   : > { %3490 = vmatprep.mubr.bf16.mxu1 %v2194_v8  ;;  %3567 = vmatpush3.bf16.msra.mxu1 %v3695_v42 }
 0x838   : > { %3491 = vmatmul.mubr.bf16.gmra.mrb[76].mxu1 %v2195_v21  ;;  %3560 = vmatprep.subr.bf16.mxu1 %v3696_v43 }
 0x83b   : > { %3568 = vmatpush3.bf16.msra.mxu1 %v3696_v43 }
 0x83c   : > { %3561 = vmatprep.subr.bf16.mxu1 %v3697_v36 }
 0x83f   : > { %3569 = vmatpush3.bf16.msra.mxu1 %v3697_v36 }
 0x840   : > { %3562 = vmatprep.subr.bf16.mxu1 %v4360_v33 }
 0x843   : > { %3570 = vmatpush3.bf16.msra.mxu1 %v4360_v33 }
 0x8f3   : > { %v3480_v39 = vpop.f32.mrb[64].mxu1 }
 0x8f4   : > { %v2312_v37 = vadd.f32 %v3480_v39, %v4367_v30  ;;  %v2303_v38 = vpop.f32.mrb[65].mxu1 }
 0x8f5   : > { %v2304_v32 = vadd.f32 %v4367_v30, %v2303_v38  ;;  %v3481_v19 = vpop.f32.mrb[66].mxu1 }
 0x8f6   : > { %v2315_v54 = vadd.f32 %v3481_v19, %v4367_v30  ;;  %v2306_v46 = vpop.f32.mrb[67].mxu1  ;;  %v2368_v51 = vmax.f32 %v2312_v37, 0.0 }
 0x8f7   : > { %v2307_v56 = vadd.f32 %v4367_v30, %v2306_v46  ;;  %v2366_v52 = vmax.f32 %v2304_v32, 0.0 }
 0x8f8   : > { %v2369_v50 = vmax.f32 %v2315_v54, 0.0 }
 0x8f9   : > { %v2367_v57 = vmax.f32 %v2307_v56, 0.0 }
 0x8fa   : > { %v2383_v58 = vpack.c.bf16 %v2369_v50, %v2368_v51 }
 0x8fb   : > { %v2382_v59 = vpack.c.bf16 %v2367_v57, %v2366_v52  ;;  %v3484_v60 = vpop.f32.mrb[68].mxu1  ;;  %v3699_v52 = vld [vmem:[%s4484_s7 + $0x28] sm:$0xff]   ;;  %v4399_v57 = vld [vmem:[%s4483_s6 + $0x4] ss:$0 sm:$0xff] }
 0x8fc   : > { %v2328_v48 = vadd.f32 %v3484_v60, %v4367_v30  ;;  %v2319_v45 = vpop.f32.mrb[69].mxu1  ;;  %3563 = vmatprep.subr.bf16.mxu1 %v3699_v52 }
 0x8fd   : > { %v2320_v53 = vadd.f32 %v4367_v30, %v2319_v45  ;;  %v3485_v55 = vpop.f32.mrb[70].mxu1  ;;  %3510 = vmatprep.mubr.bf16.mxu0 %v2382_v59  ;;  %3571 = vmatpush3.bf16.msra.mxu1 %v3699_v52 }
 0x8fe   : > { %v2331_v62 = vadd.f32 %v3485_v55, %v4367_v30  ;;  %v2322_v0 = vpop.f32.mrb[71].mxu1  ;;  %3511 = vmatmul.mubr.bf16.vlgmr.msra.gmra.mrb[80].mxu0 %v2383_v58  ;;  %v2372_v26 = vmax.f32 %v2328_v48, 0.0 }
 0x8ff   : > { %v2323_v7 = vadd.f32 %v4367_v30, %v2322_v0  ;;  %3527 = vmatpush3.bf16.msra.mxu0 %v3694_v28  ;;  %v2370_v47 = vmax.f32 %v2320_v53, 0.0 }
 0x900   : > { %v2373_v3 = vmax.f32 %v2331_v62, 0.0  ;;  %3528 = vmatprep.subr.bf16.mxu0 %v3695_v42 }
 0x901   : > { %v2371_v9 = vmax.f32 %v2323_v7, 0.0 }
 0x902   : > { %v2385_v15 = vpack.c.bf16 %v2373_v3, %v2372_v26 }
 0x903   : > { %v2384_v1 = vpack.c.bf16 %v2371_v9, %v2370_v47  ;;  %v3488_v11 = vpop.f32.mrb[72].mxu1  ;;  %3529 = vmatpush3.bf16.msra.mxu0 %v3695_v42 }
 0x904   : > { %v2344_v49 = vadd.f32 %v3488_v11, %v4367_v30  ;;  %v2335_v6 = vpop.f32.mrb[73].mxu1  ;;  %3530 = vmatprep.subr.bf16.mxu0 %v3696_v43 }
 0x905   : > { %v2336_v12 = vadd.f32 %v4367_v30, %v2335_v6  ;;  %v3489_v10 = vpop.f32.mrb[74].mxu1  ;;  %3514 = vmatprep.mubr.bf16.mxu0 %v2384_v1 }
 0x906   : > { %v2347_v17 = vadd.f32 %v3489_v10, %v4367_v30  ;;  %v2338_v40 = vpop.f32.mrb[75].mxu1  ;;  %3515 = vmatmul.mubr.bf16.gmra.mrb[84].mxu0 %v2385_v15  ;;  %v2376_v25 = vmax.f32 %v2344_v49, 0.0 }
 0x907   : > { %v2339_v16 = vadd.f32 %v4367_v30, %v2338_v40  ;;  %3531 = vmatpush3.bf16.msra.mxu0 %v3696_v43  ;;  %v2374_v8 = vmax.f32 %v2336_v12, 0.0 }
 0x908   : > { %v2377_v24 = vmax.f32 %v2347_v17, 0.0  ;;  %3532 = vmatprep.subr.bf16.mxu0 %v3697_v36 }
 0x909   : > { %v2375_v21 = vmax.f32 %v2339_v16, 0.0 }
 0x90a   : > { %v2387_v34 = vpack.c.bf16 %v2377_v24, %v2376_v25 }
 0x90b   : > { %v2386_v27 = vpack.c.bf16 %v2375_v21, %v2374_v8  ;;  %v3492_v28 = vpop.f32.mrb[76].mxu1  ;;  %3533 = vmatpush3.bf16.msra.mxu0 %v3697_v36 }
 0x90c   : > { %v2360_v42 = vadd.f32 %v3492_v28, %v4367_v30  ;;  %v2351_v39 = vpop.f32.mrb[77].mxu1  ;;  %3534 = vmatprep.subr.bf16.mxu0 %v4360_v33 }
 0x90d   : > { %v2352_v37 = vadd.f32 %v4367_v30, %v2351_v39  ;;  %v3493_v38 = vpop.f32.mrb[78].mxu1  ;;  %3518 = vmatprep.mubr.bf16.mxu0 %v2386_v27 }
 0x90e   : > { %v2363_v43 = vadd.f32 %v3493_v38, %v4367_v30  ;;  %v2354_v32 = vpop.f32.mrb[79].mxu1  ;;  %3519 = vmatmul.mubr.bf16.gmra.mrb[88].mxu0 %v2387_v34  ;;  %v2380_v54 = vmax.f32 %v2360_v42, 0.0 }
 0x90f   : > { %v2355_v19 = vadd.f32 %v4367_v30, %v2354_v32  ;;  %3535 = vmatpush3.bf16.msra.mxu0 %v4360_v33  ;;  %v2378_v36 = vmax.f32 %v2352_v37, 0.0  ;;  %v3700_v33 = vld [vmem:[%s4484_s7 + $0x30] sm:$0xff]   ;;  %v3701_v30 = vld [vmem:[%s4484_s7 + $0x38] sm:$0xff]  }
 0x910   : > { %v2381_v46 = vmax.f32 %v2363_v43, 0.0  ;;  %3536 = vmatprep.subr.bf16.mxu0 %v3699_v52  ;;  %3564 = vmatprep.subr.bf16.mxu1 %v3700_v33 }
 0x911   : > { %v2379_v56 = vmax.f32 %v2355_v19, 0.0  ;;  %3572 = vmatpush3.bf16.msra.mxu1 %v3700_v33 }
 0x912   : > { %v2389_v51 = vpack.c.bf16 %v2381_v46, %v2380_v54  ;;  %3565 = vmatprep.subr.bf16.mxu1 %v3701_v30 }
 0x913   : > { %v2388_v50 = vpack.c.bf16 %v2379_v56, %v2378_v36  ;;  %3537 = vmatpush3.bf16.msra.mxu0 %v3699_v52 }
 0x914   : > { %3538 = vmatprep.subr.bf16.mxu0 %v3700_v33 }
 0x915   : > { %3522 = vmatprep.mubr.bf16.mxu0 %v2388_v50  ;;  %3573 = vmatpush3.bf16.msra.mxu1 %v3701_v30 }
 0x916   : > { %3523 = vmatmul.mubr.bf16.gmra.mrb[92].mxu0 %v2389_v51 }
 0x917   : > { %3539 = vmatpush3.bf16.msra.mxu0 %v3700_v33 }
 0x918   : > { %3540 = vmatprep.subr.bf16.mxu0 %v3701_v30 }
 0x91b   : > { %3541 = vmatpush3.bf16.msra.mxu0 %v3701_v30 }
 0x9d1   : > { %v3512_v58 = vpop.f32.mrb[80].mxu0 }
 0x9d2   : > { %v2506_v59 = vadd.f32 %v3512_v58, %v4399_v57  ;;  %v2497_v60 = vpop.f32.mrb[81].mxu0 }
 0x9d3   : > { %v2498_v48 = vadd.f32 %v4399_v57, %v2497_v60  ;;  %v3513_v45 = vpop.f32.mrb[82].mxu0 }
 0x9d4   : > { %v2562_v53 = vadd.f32 %v2506_v59, %v4273_v31  ;;  %v2509_v55 = vadd.f32 %v3513_v45, %v4399_v57  ;;  %v2500_v62 = vpop.f32.mrb[83].mxu0 }
 0x9d5   : > { %v2560_v0 = vadd.f32 %v2498_v48, %v4269_v18  ;;  %v2501_v7 = vadd.f32 %v4399_v57, %v2500_v62 }
 0x9d6   : > { %v2563_v26 = vadd.f32 %v2509_v55, %v4276_v22  ;;  %v2578_v47 = vmax.f32 %v2562_v53, 0.0 }
 0x9d7   : > { %v2561_v3 = vadd.f32 %v2501_v7, %v4279_v14  ;;  %v2576_v15 = vmax.f32 %v2560_v0, 0.0 }
 0x9d8   : > { %v2579_v9 = vmax.f32 %v2563_v26, 0.0 }
 0x9d9   : > { %v2577_v1 = vmax.f32 %v2561_v3, 0.0  ;;  %v3516_v11 = vpop.f32.mrb[84].mxu0 }
 0x9da   : > { %v2593_v49 = vpack.c.bf16 %v2579_v9, %v2578_v47  ;;  %v2522_v6 = vadd.f32 %v3516_v11, %v4399_v57  ;;  %v2513_v31 = vpop.f32.mrb[85].mxu0 }
 0x9db   : > { %v2514_v12 = vadd.f32 %v4399_v57, %v2513_v31  ;;  %v3517_v10 = vpop.f32.mrb[86].mxu0  ;;  %v2592_v17 = vpack.c.bf16 %v2577_v1, %v2576_v15 }
 0x9dc   : > { %v2566_v18 = vadd.f32 %v2522_v6, %v4293_v44  ;;  %v2525_v40 = vadd.f32 %v3517_v10, %v4399_v57  ;;  %v2516_v22 = vpop.f32.mrb[87].mxu0 }
 0x9dd   : > { %v2564_v14 = vadd.f32 %v2514_v12, %v4289_v35  ;;  %v2517_v16 = vadd.f32 %v4399_v57, %v2516_v22  ;;  %3542 = vmatprep.mubr.bf16.mxu0 %v2592_v17 }
 0x9de   : > { %v2567_v25 = vadd.f32 %v2525_v40, %v4296_v23  ;;  %3543 = vmatmul.mubr.bf16.vlgmr.msra.gmra.mrb[96].mxu0 %v2593_v49  ;;  %v2582_v8 = vmax.f32 %v2566_v18, 0.0 }
 0x9df   : > { %v2565_v24 = vadd.f32 %v2517_v16, %v4299_v41  ;;  %v2580_v34 = vmax.f32 %v2564_v14, 0.0 }
 0x9e0   : > { %v2583_v21 = vmax.f32 %v2567_v25, 0.0 }
 0x9e1   : > { %v2581_v27 = vmax.f32 %v2565_v24, 0.0  ;;  %v3520_v28 = vpop.f32.mrb[88].mxu0 }
 0x9e2   : > { %v2595_v42 = vpack.c.bf16 %v2583_v21, %v2582_v8  ;;  %v2538_v44 = vadd.f32 %v3520_v28, %v4399_v57  ;;  %v2529_v39 = vpop.f32.mrb[89].mxu0 }
 0x9e3   : > { %v2530_v37 = vadd.f32 %v4399_v57, %v2529_v39  ;;  %v3521_v35 = vpop.f32.mrb[90].mxu0  ;;  %v2594_v38 = vpack.c.bf16 %v2581_v27, %v2580_v34 }
 0x9e4   : > { %v2570_v43 = vadd.f32 %v2538_v44, %v4313_v5  ;;  %v2541_v23 = vadd.f32 %v3521_v35, %v4399_v57  ;;  %v2532_v32 = vpop.f32.mrb[91].mxu0 }
 0x9e5   : > { %v2568_v41 = vadd.f32 %v2530_v37, %v4309_v61  ;;  %v2533_v19 = vadd.f32 %v4399_v57, %v2532_v32  ;;  %3546 = vmatprep.mubr.bf16.mxu1 %v2594_v38 }
 0x9e6   : > { %v2571_v54 = vadd.f32 %v2541_v23, %v4316_v2  ;;  %3547 = vmatmul.mubr.bf16.vlgmr.msra.gmra.mrb[80].mxu1 %v2595_v42  ;;  %v2586_v36 = vmax.f32 %v2570_v43, 0.0 }
 0x9e7   : > { %v2569_v46 = vadd.f32 %v2533_v19, %v4319_v4  ;;  %v2584_v51 = vmax.f32 %v2568_v41, 0.0 }
 0x9e8   : > { %v2587_v56 = vmax.f32 %v2571_v54, 0.0 }
 0x9e9   : > { %v2585_v50 = vmax.f32 %v2569_v46, 0.0  ;;  %v3524_v52 = vpop.f32.mrb[92].mxu0 }
 0x9ea   : > { %v2554_v5 = vadd.f32 %v3524_v52, %v4399_v57  ;;  %v2545_v33 = vpop.f32.mrb[93].mxu0  ;;  %v2597_v30 = vpack.c.bf16 %v2587_v56, %v2586_v36 }
 0x9eb   : > { %v2546_v58 = vadd.f32 %v4399_v57, %v2545_v33  ;;  %v3525_v61 = vpop.f32.mrb[94].mxu0  ;;  %v2596_v59 = vpack.c.bf16 %v2585_v50, %v2584_v51 }
 0x9ec   : > { %v2574_v60 = vadd.f32 %v2554_v5, %v4333_v20  ;;  %v2557_v2 = vadd.f32 %v3525_v61, %v4399_v57  ;;  %v2548_v48 = vpop.f32.mrb[95].mxu0 }
 0x9ed   : > { %v2572_v4 = vadd.f32 %v2546_v58, %v4329_v29  ;;  %v2549_v45 = vadd.f32 %v4399_v57, %v2548_v48  ;;  %3550 = vmatprep.mubr.bf16.mxu1 %v2596_v59  ;;  %v2992_v29 = vld [vmem:[%s4485_s8] ss:$0 sm:$0xff] }
 0x9ee   : > { %v2575_v53 = vadd.f32 %v2557_v2, %v4336_v13  ;;  %3551 = vmatmul.mubr.bf16.gmra.mrb[84].mxu1 %v2597_v30  ;;  %v2590_v62 = vmax.f32 %v2574_v60, 0.0 }
 0x9ef   : > { %v2573_v55 = vadd.f32 %v2549_v45, %v4339_v63  ;;  %v2588_v7 = vmax.f32 %v2572_v4, 0.0 }
 0x9f0   : > { %v2591_v0 = vmax.f32 %v2575_v53, 0.0 }
 0x9f1   : > { %v2589_v26 = vmax.f32 %v2573_v55, 0.0 }
 0x9f2   : > { %v2599_v3 = vpack.c.bf16 %v2591_v0, %v2590_v62 }
 0x9f3   : > { %v2598_v20 = vpack.c.bf16 %v2589_v26, %v2588_v7 }
 0x9f5   : > { %3554 = vmatprep.mubr.bf16.mxu1 %v2598_v20 }
 0x9f6   : > { %3555 = vmatmul.mubr.bf16.gmra.mrb[88].mxu1 %v2599_v3 }
 0xab1   : > { %v3544_v13 = vpop.f32.mrb[96].mxu0 }
 0xab2   : > { %v2714_v63 = vadd.f32 %v3544_v13, %v2992_v29  ;;  %v2705_v57 = vpop.f32.mrb[97].mxu0 }
 0xab3   : > { %v2706_v47 = vadd.f32 %v2992_v29, %v2705_v57  ;;  %v3545_v9 = vpop.f32.mrb[98].mxu0 }
 0xab4   : > { %2771 = vst.msk [vmem:[%s4440_s18 + $0x10] sm:$0xff] %vm2768_vm1, %v2714_v63  ;;  %v2717_v15 = vadd.f32 %v3545_v9, %v2992_v29  ;;  %v2708_v1 = vpop.f32.mrb[99].mxu0 }
 0xab5   : > { %2769 = vst.msk [vmem:[%s4440_s18] sm:$0xff] %vm2768_vm1, %v2706_v47  ;;  %v2709_v11 = vadd.f32 %v2992_v29, %v2708_v1 }
 0xab6   : > { %2772 = vst.msk [vmem:[%s4440_s18 + $0x18] sm:$0xff] %vm2768_vm1, %v2717_v15 }
 0xab7   : > { %2770 = vst.msk [vmem:[%s4440_s18 + $0x8] sm:$0xff] %vm2768_vm1, %v2709_v11 }
 0xab9   : > { %v3548_v49 = vpop.f32.mrb[80].mxu1 }
 0xaba   : > { %v2730_v6 = vadd.f32 %v3548_v49, %v2992_v29  ;;  %v2721_v31 = vpop.f32.mrb[81].mxu1 }
 0xabb   : > { %v2722_v12 = vadd.f32 %v2992_v29, %v2721_v31  ;;  %v3549_v10 = vpop.f32.mrb[82].mxu1 }
 0xabc   : > { %2775 = vst.msk [vmem:[%s4440_s18 + $0x30] sm:$0xff] %vm2768_vm1, %v2730_v6  ;;  %v2733_v17 = vadd.f32 %v3549_v10, %v2992_v29  ;;  %v2724_v18 = vpop.f32.mrb[83].mxu1 }
 0xabd   : > { %2773 = vst.msk [vmem:[%s4440_s18 + $0x20] sm:$0xff] %vm2768_vm1, %v2722_v12  ;;  %v2725_v40 = vadd.f32 %v2992_v29, %v2724_v18 }
 0xabe   : > { %2776 = vst.msk [vmem:[%s4440_s18 + $0x38] sm:$0xff] %vm2768_vm1, %v2733_v17 }
 0xabf   : > { %2774 = vst.msk [vmem:[%s4440_s18 + $0x28] sm:$0xff] %vm2768_vm1, %v2725_v40 }
 0xac1   : > { %v3552_v22 = vpop.f32.mrb[84].mxu1 }
 0xac2   : > { %v2746_v14 = vadd.f32 %v3552_v22, %v2992_v29  ;;  %v2737_v16 = vpop.f32.mrb[85].mxu1 }
 0xac3   : > { %v2738_v25 = vadd.f32 %v2992_v29, %v2737_v16  ;;  %v3553_v24 = vpop.f32.mrb[86].mxu1 }
 0xac4   : > { %2779 = vst.msk [vmem:[%s4440_s18 + $0x50] sm:$0xff] %vm2768_vm1, %v2746_v14  ;;  %v2749_v8 = vadd.f32 %v3553_v24, %v2992_v29  ;;  %v2740_v21 = vpop.f32.mrb[87].mxu1 }
 0xac5   : > { %2777 = vst.msk [vmem:[%s4440_s18 + $0x40] sm:$0xff] %vm2768_vm1, %v2738_v25  ;;  %v2741_v34 = vadd.f32 %v2992_v29, %v2740_v21 }
 0xac6   : > { %2780 = vst.msk [vmem:[%s4440_s18 + $0x58] sm:$0xff] %vm2768_vm1, %v2749_v8 }
 0xac7   : > { %2778 = vst.msk [vmem:[%s4440_s18 + $0x48] sm:$0xff] %vm2768_vm1, %v2741_v34 }
 0xac9   : > { %v3556_v27 = vpop.f32.mrb[88].mxu1 }
 0xaca   : > { %v2762_v28 = vadd.f32 %v3556_v27, %v2992_v29  ;;  %v2753_v42 = vpop.f32.mrb[89].mxu1 }
 0xacb   : > { %v2754_v44 = vadd.f32 %v2992_v29, %v2753_v42  ;;  %v3557_v39 = vpop.f32.mrb[90].mxu1 }
 0xacc   : > { %2783 = vst.msk [vmem:[%s4440_s18 + $0x70] sm:$0xff] %vm2768_vm1, %v2762_v28  ;;  %v2765_v37 = vadd.f32 %v3557_v39, %v2992_v29  ;;  %v2756_v35 = vpop.f32.mrb[91].mxu1 }
 0xacd   : > { %2781 = vst.msk [vmem:[%s4440_s18 + $0x60] sm:$0xff] %vm2768_vm1, %v2754_v44  ;;  %v2757_v38 = vadd.f32 %v2992_v29, %v2756_v35 }
 0xace   : > { %2784 = vst.msk [vmem:[%s4440_s18 + $0x78] sm:$0xff] %vm2768_vm1, %v2765_v37 }
 0xacf   : > { %2782 = vst.msk [vmem:[%s4440_s18 + $0x68] sm:$0xff] %vm2768_vm1, %v2757_v38 }
 0xad0 PF: > { %s21_s30 = sadd.s32 1, %s3772_s30  }
 0xad1   : > { %p18_p5 = scmp.ge.s32.totalorder %s21_s30, 4  }
 0xad3   :  { %20 = sbr.rel (!%p18_p5) target bundleno = 2 (0x2), region = 111 }
 0xada   :  { %2807 = vsyncpa [#allocation3], 1 }
 0xadb   :  { %2809 = vsyncpa [#allocation3 + $0x1], 1 }
 0xadc   :  { %2810 = vsyncpa [#allocation5], 1 }

</bundles_post_ra>
